<compile_context>
chip_gen: v5e
topology: v5e:2x2
jax: 0.10.0
libtpu: 0.0.40
codegen_flags: <defaults>
</compile_context>

<pallas_src>
from functools import partial

import jax
import jax.numpy as jnp
from jax.experimental import pallas as pl
from jax.experimental.pallas import tpu as pltpu


def encoder_block_kernel(
    x_ref,
    ln1_g_ref, ln1_b_ref,
    wq_ref, bq_ref,          # Q projection (scale pre-folded), bf16 weight
    wkv_ref, bkv_ref,        # fused [K | V] projection, bf16 weight
    ln2_g_ref, ln2_b_ref,
    w1_ref, b1_ref, w2_ref, b2_ref,
    o_ref,
    *, num_heads, tq,
):
    eps = 1e-5
    qi = pl.program_id(1)
    row0 = pl.multiple_of(qi * tq, tq)

    x_full = x_ref[0].astype(jnp.float32)                       # (N, C)
    x_q = x_ref[0, pl.ds(row0, tq), :].astype(jnp.float32)      # (TQ, C)
    N, C = x_full.shape
    Dh = C // num_heads

    def layernorm(v, g, b):
        mu = jnp.mean(v, axis=-1, keepdims=True)
        var = jnp.mean(jnp.square(v - mu), axis=-1, keepdims=True)
        return (v - mu) * jax.lax.rsqrt(var + eps) * g + b

    g1 = ln1_g_ref[...].astype(jnp.float32)
    be1 = ln1_b_ref[...].astype(jnp.float32)
    xn1_full = layernorm(x_full, g1, be1)      # all tokens -> K/V
    xn1_q = layernorm(x_q, g1, be1)            # this query tile -> Q

    # --- projections: bf16 operands, f32 accumulation ---------------------
    q = jnp.dot(xn1_q.astype(jnp.bfloat16), wq_ref[...],
                preferred_element_type=jnp.float32) + bq_ref[...]        # (TQ, C)
    kv = jnp.dot(xn1_full.astype(jnp.bfloat16), wkv_ref[...],
                 preferred_element_type=jnp.float32) + bkv_ref[...]      # (N, 2C)
    k = kv[:, :C]
    v = kv[:, C:]

    # --- multi-head attention, heads as a batch dimension -----------------
    qh = q.reshape(tq, num_heads, Dh).transpose(1, 0, 2).astype(jnp.bfloat16)  # (H,TQ,Dh)
    kh = k.reshape(N, num_heads, Dh).transpose(1, 0, 2).astype(jnp.bfloat16)   # (H,N,Dh)
    vh = v.reshape(N, num_heads, Dh).transpose(1, 0, 2).astype(jnp.bfloat16)   # (H,N,Dh)

    # NOTE: scale (embed_dim ** -0.5, per the reference module) is already
    # folded into wq/bq by the wrapper.
    s = jnp.einsum("hqd,hkd->hqk", qh, kh,
                   preferred_element_type=jnp.float32)           # (H, TQ, N)
    s = s - jnp.max(s, axis=-1, keepdims=True)
    p = jnp.exp(s)
    denom = jnp.sum(p, axis=-1, keepdims=True)
    p = p * pl.reciprocal(denom, approx=True)                    # EUP reciprocal

    ctx = jnp.einsum("hqk,hkd->hqd", p.astype(jnp.bfloat16), vh,
                     preferred_element_type=jnp.float32)         # (H, TQ, Dh)
    attn = ctx.transpose(1, 0, 2).reshape(tq, C)                 # (TQ, C)

    xr = x_q + attn                                              # residual 1

    # --- FFN ----------------------------------------------------------------
    g2 = ln2_g_ref[...].astype(jnp.float32)
    be2 = ln2_b_ref[...].astype(jnp.float32)
    xn2 = layernorm(xr, g2, be2)

    h = jnp.dot(xn2.astype(jnp.bfloat16), w1_ref[...],
                preferred_element_type=jnp.float32) + b1_ref[...]        # (TQ, hidden)
    h = jax.nn.gelu(h, approximate=True)      # tanh GELU -> EUP slot
    # TODO(synk): dropout layers are identity here (inference mode).
    ffn = jnp.dot(h.astype(jnp.bfloat16), w2_ref[...],
                  preferred_element_type=jnp.float32) + b2_ref[...]      # (TQ, C)

    o_ref[0] = (xr + ffn).astype(o_ref.dtype)


def _default_token_tile(n):
    if n <= 128:
        return n
    for t in (128, 64, 32, 16, 8):
        if n % t == 0:
            return t
    return n


def transformer_encoder_block(x, params, num_heads, tq=None):
    B, N, C = x.shape
    hidden = params["w1"].shape[1]
    assert C % num_heads == 0
    scale = float(C) ** (-0.5)

    tq = _default_token_tile(N) if tq is None else tq
    assert N % tq == 0, "token tile must divide N"
    assert tq == N or tq % 8 == 0, "token tile must be a multiple of 8"
    n_tiles = N // tq

    f32, bf16 = jnp.float32, jnp.bfloat16
    # Fold the attention scale into the Q projection, fuse K and V, and cast
    # MXU weights to bf16 (biases stay f32: added after f32 accumulation).
    param_vals = [
        params["ln1_g"].astype(f32), params["ln1_b"].astype(f32),
        (params["wq"] * scale).astype(bf16), (params["bq"] * scale).astype(f32),
        jnp.concatenate([params["wk"], params["wv"]], axis=1).astype(bf16),
        jnp.concatenate([params["bk"], params["bv"]], axis=1).astype(f32),
        params["ln2_g"].astype(f32), params["ln2_b"].astype(f32),
        params["w1"].astype(bf16), params["b1"].astype(f32),
        params["w2"].astype(bf16), params["b2"].astype(f32),
    ]

    # Weights/biases: whole-array, VMEM-resident, single-buffered (not pipelined).
    resident = pl.BlockSpec(memory_space=pltpu.MemorySpace.VMEM)
    in_specs = [pl.BlockSpec((1, N, C), lambda b, t: (b, 0, 0))]
    in_specs += [resident] * len(param_vals)
    out_specs = pl.BlockSpec((1, tq, C), lambda b, t: (b, t, 0))

    # VMEM budget: single-buffered weights + double-buffered activation blocks
    # + f32 working set (sized so realistic configs also fit v7x's 64 MiB VMEM).
    weight_bytes = sum(int(p.size) * p.dtype.itemsize for p in param_vals)
    work_bytes = 4 * (
        2 * N * C + 2 * tq * C                 # pipelined in/out blocks
        + 3 * N * C                            # xn1 + fused kv
        + 2 * num_heads * tq * N               # scores + probs
        + 2 * tq * hidden                      # FFN hidden activation
        + 4 * tq * C                           # q / attn / residual temporaries
    )
    vmem_limit = int(min(max(2 * (weight_bytes + work_bytes), 32 << 20), 64 << 20))

    kernel = partial(encoder_block_kernel, num_heads=num_heads, tq=tq)

    return pl.pallas_call(
        kernel,
        out_shape=jax.ShapeDtypeStruct((B, N, C), x.dtype),
        grid_spec=pltpu.PrefetchScalarGridSpec(
            num_scalar_prefetch=0,
            grid=(B, n_tiles),
            in_specs=in_specs,
            out_specs=out_specs,
        ),
        compiler_params=pltpu.CompilerParams(
            dimension_semantics=("parallel", "parallel"),
            vmem_limit_bytes=vmem_limit,
        ),
    )(x, *param_vals)


def reference_block(x, params, num_heads):
    """Pure-JAX f32 reference mirroring the PyTorch forward (eval mode)."""
    B, N, C = x.shape
    Dh = C // num_heads
    eps = 1e-5

    def ln(v, g, b):
        mu = jnp.mean(v, axis=-1, keepdims=True)
        var = jnp.mean((v - mu) ** 2, axis=-1, keepdims=True)
        return (v - mu) / jnp.sqrt(var + eps) * g + b

    xn1 = ln(x, params["ln1_g"], params["ln1_b"])
    q = xn1 @ params["wq"] + params["bq"]
    k = xn1 @ params["wk"] + params["bk"]
    v = xn1 @ params["wv"] + params["bv"]
    q = q.reshape(B, N, num_heads, Dh).transpose(0, 2, 1, 3)
    k = k.reshape(B, N, num_heads, Dh).transpose(0, 2, 1, 3)
    v = v.reshape(B, N, num_heads, Dh).transpose(0, 2, 1, 3)
    attn = jnp.einsum("bhnd,bhmd->bhnm", q, k) * (float(C) ** -0.5)
    attn = jax.nn.softmax(attn, axis=-1)
    out = jnp.einsum("bhnm,bhmd->bhnd", attn, v)
    out = out.transpose(0, 2, 1, 3).reshape(B, N, C)
    x = x + out
    xn2 = ln(x, params["ln2_g"], params["ln2_b"])
    h1 = jax.nn.gelu(xn2 @ params["w1"] + params["b1"], approximate=False)
    x = x + (h1 @ params["w2"] + params["b2"])
    return x


def make_params(key, embed_dim, hidden_dim):
    ks = jax.random.split(key, 8)
    s = 0.02
    return {
        "ln1_g": jnp.ones((1, embed_dim), jnp.float32),
        "ln1_b": jnp.zeros((1, embed_dim), jnp.float32),
        "wq": s * jax.random.normal(ks[0], (embed_dim, embed_dim), jnp.float32),
        "bq": s * jax.random.normal(ks[1], (1, embed_dim), jnp.float32),
        "wk": s * jax.random.normal(ks[2], (embed_dim, embed_dim), jnp.float32),
        "bk": s * jax.random.normal(ks[3], (1, embed_dim), jnp.float32),
        "wv": s * jax.random.normal(ks[4], (embed_dim, embed_dim), jnp.float32),
        "bv": s * jax.random.normal(ks[5], (1, embed_dim), jnp.float32),
        "ln2_g": jnp.ones((1, embed_dim), jnp.float32),
        "ln2_b": jnp.zeros((1, embed_dim), jnp.float32),
        "w1": s * jax.random.normal(ks[6], (embed_dim, hidden_dim), jnp.float32),
        "b1": jnp.zeros((1, hidden_dim), jnp.float32),
        "w2": s * jax.random.normal(ks[7], (hidden_dim, embed_dim), jnp.float32),
        "b2": jnp.zeros((1, embed_dim), jnp.float32),
    }


if __name__ == "__main__":
    # Small shapes consistent with the module: (B, N, C) tokens; two query tiles.
    B, N, C, H, HIDDEN = 2, 16, 32, 4, 64

    key = jax.random.PRNGKey(0)
    kx, kp = jax.random.split(key)
    x = jax.random.normal(kx, (B, N, C), jnp.float32)
    params = make_params(kp, C, HIDDEN)

    out = transformer_encoder_block(x, params, num_heads=H, tq=8)
    out = jax.block_until_ready(out)

    ref = reference_block(x, params, num_heads=H)
    assert out.shape == (B, N, C)
    max_err = float(jnp.max(jnp.abs(out - ref)))
    # bf16 MXU inputs + approx reciprocal/tanh-GELU -> slightly looser tolerance.
    assert jnp.allclose(out, ref, atol=1e-2, rtol=1e-2), (
        f"mismatch vs reference (max abs err {max_err})"
    )

    print("KERNEL_OK")
</pallas_src>

<mosaic_0001>
module attributes {stable_mosaic.version = 11 : i64} {
  func.func @encoder_block_kernel(%arg0: i32, %arg1: i32, %arg2: memref<1x16x32xf32, #tpu.memory_space<vmem>>, %arg3: memref<1x32xf32, #tpu.memory_space<vmem>>, %arg4: memref<1x32xf32, #tpu.memory_space<vmem>>, %arg5: memref<32x32xbf16, #tpu.memory_space<vmem>>, %arg6: memref<1x32xf32, #tpu.memory_space<vmem>>, %arg7: memref<32x64xbf16, #tpu.memory_space<vmem>>, %arg8: memref<1x64xf32, #tpu.memory_space<vmem>>, %arg9: memref<1x32xf32, #tpu.memory_space<vmem>>, %arg10: memref<1x32xf32, #tpu.memory_space<vmem>>, %arg11: memref<32x64xbf16, #tpu.memory_space<vmem>>, %arg12: memref<1x64xf32, #tpu.memory_space<vmem>>, %arg13: memref<64x32xbf16, #tpu.memory_space<vmem>>, %arg14: memref<1x32xf32, #tpu.memory_space<vmem>>, %arg15: memref<1x8x32xf32, #tpu.memory_space<vmem>>) attributes {dimension_semantics = [#tpu.dimension_semantics<parallel>, #tpu.dimension_semantics<parallel>], iteration_bounds = array<i64: 2, 2>, scalar_prefetch = 0 : i64, scratch_operands = 0 : i64, tpu.core_type = #tpu.core_type<tc>, window_params = [{transform_indices = @transform_0, window_bounds = array<i64: 1, 16, 32>}, {pipeline_mode = #tpu.pipeline_mode<synchronous>, transform_indices = @transform_1, window_bounds = array<i64: 1, 32>}, {pipeline_mode = #tpu.pipeline_mode<synchronous>, transform_indices = @transform_2, window_bounds = array<i64: 1, 32>}, {pipeline_mode = #tpu.pipeline_mode<synchronous>, transform_indices = @transform_3, window_bounds = array<i64: 32, 32>}, {pipeline_mode = #tpu.pipeline_mode<synchronous>, transform_indices = @transform_4, window_bounds = array<i64: 1, 32>}, {pipeline_mode = #tpu.pipeline_mode<synchronous>, transform_indices = @transform_5, window_bounds = array<i64: 32, 64>}, {pipeline_mode = #tpu.pipeline_mode<synchronous>, transform_indices = @transform_6, window_bounds = array<i64: 1, 64>}, {pipeline_mode = #tpu.pipeline_mode<synchronous>, transform_indices = @transform_7, window_bounds = array<i64: 1, 32>}, {pipeline_mode = #tpu.pipeline_mode<synchronous>, transform_indices = @transform_8, window_bounds = array<i64: 1, 32>}, {pipeline_mode = #tpu.pipeline_mode<synchronous>, transform_indices = @transform_9, window_bounds = array<i64: 32, 64>}, {pipeline_mode = #tpu.pipeline_mode<synchronous>, transform_indices = @transform_10, window_bounds = array<i64: 1, 64>}, {pipeline_mode = #tpu.pipeline_mode<synchronous>, transform_indices = @transform_11, window_bounds = array<i64: 64, 32>}, {pipeline_mode = #tpu.pipeline_mode<synchronous>, transform_indices = @transform_12, window_bounds = array<i64: 1, 32>}, {transform_indices = @transform_13, window_bounds = array<i64: 1, 8, 32>}]} {
    %c8_i32 = arith.constant 8 : i32
    %0 = arith.muli %arg1, %c8_i32 : i32
    %1 = tpu.assume_multiple %0, 8 : i32
    %c0 = arith.constant 0 : index
    %c0_0 = arith.constant 0 : index
    %c0_1 = arith.constant 0 : index
    %2 = vector.load %arg2[%c0, %c0_0, %c0_1] : memref<1x16x32xf32, #tpu.memory_space<vmem>>, vector<1x16x32xf32>
    %3 = vector.shape_cast %2 : vector<1x16x32xf32> to vector<16x32xf32>
    %c0_2 = arith.constant 0 : index
    %4 = arith.index_cast %1 : i32 to index
    %c0_3 = arith.constant 0 : index
    %5 = vector.load %arg2[%c0_2, %4, %c0_3] : memref<1x16x32xf32, #tpu.memory_space<vmem>>, vector<1x8x32xf32>
    %6 = vector.shape_cast %5 : vector<1x8x32xf32> to vector<8x32xf32>
    %c0_4 = arith.constant 0 : index
    %c0_5 = arith.constant 0 : index
    %7 = vector.load %arg3[%c0_4, %c0_5] : memref<1x32xf32, #tpu.memory_space<vmem>>, vector<1x32xf32>
    %c0_6 = arith.constant 0 : index
    %c0_7 = arith.constant 0 : index
    %8 = vector.load %arg4[%c0_6, %c0_7] : memref<1x32xf32, #tpu.memory_space<vmem>>, vector<1x32xf32>
    %cst = arith.constant dense<0.000000e+00> : vector<16xf32>
    %9 = vector.multi_reduction <add>, %3, %cst [1] : vector<16x32xf32> to vector<16xf32>
    %10 = vector.shape_cast %9 : vector<16xf32> to vector<16x1xf32>
    %cst_8 = arith.constant 3.200000e+01 : f32
    %11 = vector.broadcast %cst_8 : f32 to vector<16x1xf32>
    %12 = arith.divf %10, %11 : vector<16x1xf32>
    %13 = vector.broadcast %12 : vector<16x1xf32> to vector<16x32xf32>
    %14 = arith.subf %3, %13 : vector<16x32xf32>
    %15 = arith.mulf %14, %14 : vector<16x32xf32>
    %cst_9 = arith.constant dense<0.000000e+00> : vector<16xf32>
    %16 = vector.multi_reduction <add>, %15, %cst_9 [1] : vector<16x32xf32> to vector<16xf32>
    %17 = vector.shape_cast %16 : vector<16xf32> to vector<16x1xf32>
    %cst_10 = arith.constant 3.200000e+01 : f32
    %18 = vector.broadcast %cst_10 : f32 to vector<16x1xf32>
    %19 = arith.divf %17, %18 : vector<16x1xf32>
    %20 = vector.broadcast %12 : vector<16x1xf32> to vector<16x32xf32>
    %21 = arith.subf %3, %20 : vector<16x32xf32>
    %cst_11 = arith.constant 9.99999974E-6 : f32
    %22 = vector.broadcast %cst_11 : f32 to vector<16x1xf32>
    %23 = arith.addf %19, %22 : vector<16x1xf32>
    %24 = math.rsqrt %23 : vector<16x1xf32>
    %25 = vector.broadcast %24 : vector<16x1xf32> to vector<16x32xf32>
    %26 = arith.mulf %21, %25 : vector<16x32xf32>
    %27 = vector.broadcast %7 : vector<1x32xf32> to vector<16x32xf32>
    %28 = arith.mulf %26, %27 : vector<16x32xf32>
    %29 = vector.broadcast %8 : vector<1x32xf32> to vector<16x32xf32>
    %30 = arith.addf %28, %29 : vector<16x32xf32>
    %cst_12 = arith.constant dense<0.000000e+00> : vector<8xf32>
    %31 = vector.multi_reduction <add>, %6, %cst_12 [1] : vector<8x32xf32> to vector<8xf32>
    %32 = vector.shape_cast %31 : vector<8xf32> to vector<8x1xf32>
    %cst_13 = arith.constant 3.200000e+01 : f32
    %33 = vector.broadcast %cst_13 : f32 to vector<8x1xf32>
    %34 = arith.divf %32, %33 : vector<8x1xf32>
    %35 = vector.broadcast %34 : vector<8x1xf32> to vector<8x32xf32>
    %36 = arith.subf %6, %35 : vector<8x32xf32>
    %37 = arith.mulf %36, %36 : vector<8x32xf32>
    %cst_14 = arith.constant dense<0.000000e+00> : vector<8xf32>
    %38 = vector.multi_reduction <add>, %37, %cst_14 [1] : vector<8x32xf32> to vector<8xf32>
    %39 = vector.shape_cast %38 : vector<8xf32> to vector<8x1xf32>
    %cst_15 = arith.constant 3.200000e+01 : f32
    %40 = vector.broadcast %cst_15 : f32 to vector<8x1xf32>
    %41 = arith.divf %39, %40 : vector<8x1xf32>
    %42 = vector.broadcast %34 : vector<8x1xf32> to vector<8x32xf32>
    %43 = arith.subf %6, %42 : vector<8x32xf32>
    %cst_16 = arith.constant 9.99999974E-6 : f32
    %44 = vector.broadcast %cst_16 : f32 to vector<8x1xf32>
    %45 = arith.addf %41, %44 : vector<8x1xf32>
    %46 = math.rsqrt %45 : vector<8x1xf32>
    %47 = vector.broadcast %46 : vector<8x1xf32> to vector<8x32xf32>
    %48 = arith.mulf %43, %47 : vector<8x32xf32>
    %49 = vector.broadcast %7 : vector<1x32xf32> to vector<8x32xf32>
    %50 = arith.mulf %48, %49 : vector<8x32xf32>
    %51 = vector.broadcast %8 : vector<1x32xf32> to vector<8x32xf32>
    %52 = arith.addf %50, %51 : vector<8x32xf32>
    %53 = arith.truncf %52 : vector<8x32xf32> to vector<8x32xbf16>
    %c0_17 = arith.constant 0 : index
    %c0_18 = arith.constant 0 : index
    %54 = vector.load %arg5[%c0_17, %c0_18] : memref<32x32xbf16, #tpu.memory_space<vmem>>, vector<32x32xbf16>
    %cst_19 = arith.constant dense<0.000000e+00> : vector<8x32xf32>
    %55 = tpu.matmul %53, %54, %cst_19 {dimension_numbers = #tpu.dot_dimension_numbers<[1], [0], [0], [1], [0, 0, 1, 1], [], []>} : vector<8x32xbf16>, vector<32x32xbf16>, vector<8x32xf32> -> vector<8x32xf32>
    %c0_20 = arith.constant 0 : index
    %c0_21 = arith.constant 0 : index
    %56 = vector.load %arg6[%c0_20, %c0_21] : memref<1x32xf32, #tpu.memory_space<vmem>>, vector<1x32xf32>
    %57 = vector.broadcast %56 : vector<1x32xf32> to vector<8x32xf32>
    %58 = arith.addf %55, %57 : vector<8x32xf32>
    %59 = arith.truncf %30 : vector<16x32xf32> to vector<16x32xbf16>
    %c0_22 = arith.constant 0 : index
    %c0_23 = arith.constant 0 : index
    %60 = vector.load %arg7[%c0_22, %c0_23] : memref<32x64xbf16, #tpu.memory_space<vmem>>, vector<32x64xbf16>
    %cst_24 = arith.constant dense<0.000000e+00> : vector<16x64xf32>
    %61 = tpu.matmul %59, %60, %cst_24 {dimension_numbers = #tpu.dot_dimension_numbers<[1], [0], [0], [1], [0, 0, 1, 1], [], []>} : vector<16x32xbf16>, vector<32x64xbf16>, vector<16x64xf32> -> vector<16x64xf32>
    %c0_25 = arith.constant 0 : index
    %c0_26 = arith.constant 0 : index
    %62 = vector.load %arg8[%c0_25, %c0_26] : memref<1x64xf32, #tpu.memory_space<vmem>>, vector<1x64xf32>
    %63 = vector.broadcast %62 : vector<1x64xf32> to vector<16x64xf32>
    %64 = arith.addf %61, %63 : vector<16x64xf32>
    %65 = vector.extract_strided_slice %64 {offsets = [0, 0], sizes = [16, 32], strides = [1, 1]} : vector<16x64xf32> to vector<16x32xf32>
    %66 = vector.extract_strided_slice %64 {offsets = [0, 32], sizes = [16, 32], strides = [1, 1]} : vector<16x64xf32> to vector<16x32xf32>
    %67 = vector.shape_cast %58 : vector<8x32xf32> to vector<8x4x8xf32>
    %68 = tpu.transpose %67, [1, 0, 2] : vector<8x4x8xf32> -> vector<4x8x8xf32>
    %69 = arith.truncf %68 : vector<4x8x8xf32> to vector<4x8x8xbf16>
    %70 = vector.shape_cast %65 : vector<16x32xf32> to vector<16x4x8xf32>
    %71 = tpu.transpose %70, [1, 0, 2] : vector<16x4x8xf32> -> vector<4x16x8xf32>
    %72 = arith.truncf %71 : vector<4x16x8xf32> to vector<4x16x8xbf16>
    %73 = vector.shape_cast %66 : vector<16x32xf32> to vector<16x4x8xf32>
    %74 = tpu.transpose %73, [1, 0, 2] : vector<16x4x8xf32> -> vector<4x16x8xf32>
    %75 = arith.truncf %74 : vector<4x16x8xf32> to vector<4x16x8xbf16>
    "tpu.trace_start"() <{level = 10 : i32, message = "hqd,hkd->hqk"}> : () -> ()
    %cst_27 = arith.constant dense<0.000000e+00> : vector<4x8x16xf32>
    %76 = tpu.matmul %69, %72, %cst_27 {dimension_numbers = #tpu.dot_dimension_numbers<[2], [2], [1], [1], [0, 0, 0, 1, 1, 1], [0], [0]>} : vector<4x8x8xbf16>, vector<4x16x8xbf16>, vector<4x8x16xf32> -> vector<4x8x16xf32>
    "tpu.trace_stop"() : () -> ()
    %cst_28 = arith.constant dense<0xFF800000> : vector<4x8xf32>
    %77 = vector.multi_reduction <maximumf>, %76, %cst_28 [2] : vector<4x8x16xf32> to vector<4x8xf32>
    %78 = vector.shape_cast %77 : vector<4x8xf32> to vector<4x8x1xf32>
    %79 = vector.broadcast %78 : vector<4x8x1xf32> to vector<4x8x16xf32>
    %80 = arith.subf %76, %79 : vector<4x8x16xf32>
    %81 = math.exp %80 : vector<4x8x16xf32>
    %cst_29 = arith.constant dense<0.000000e+00> : vector<4x8xf32>
    %82 = vector.multi_reduction <add>, %81, %cst_29 [2] : vector<4x8x16xf32> to vector<4x8xf32>
    %83 = vector.shape_cast %82 : vector<4x8xf32> to vector<4x8x1xf32>
    %84 = tpu.reciprocal %83 {approx = true} : vector<4x8x1xf32> -> vector<4x8x1xf32>
    %85 = vector.broadcast %84 : vector<4x8x1xf32> to vector<4x8x16xf32>
    %86 = arith.mulf %81, %85 : vector<4x8x16xf32>
    %87 = arith.truncf %86 : vector<4x8x16xf32> to vector<4x8x16xbf16>
    "tpu.trace_start"() <{level = 10 : i32, message = "hqk,hkd->hqd"}> : () -> ()
    %cst_30 = arith.constant dense<0.000000e+00> : vector<4x8x8xf32>
    %88 = tpu.matmul %87, %75, %cst_30 {dimension_numbers = #tpu.dot_dimension_numbers<[2], [1], [1], [2], [0, 0, 0, 1, 1, 2], [0], [0]>} : vector<4x8x16xbf16>, vector<4x16x8xbf16>, vector<4x8x8xf32> -> vector<4x8x8xf32>
    "tpu.trace_stop"() : () -> ()
    %89 = tpu.transpose %88, [1, 0, 2] : vector<4x8x8xf32> -> vector<8x4x8xf32>
    %90 = vector.shape_cast %89 : vector<8x4x8xf32> to vector<8x32xf32>
    %91 = arith.addf %6, %90 : vector<8x32xf32>
    %c0_31 = arith.constant 0 : index
    %c0_32 = arith.constant 0 : index
    %92 = vector.load %arg9[%c0_31, %c0_32] : memref<1x32xf32, #tpu.memory_space<vmem>>, vector<1x32xf32>
    %c0_33 = arith.constant 0 : index
    %c0_34 = arith.constant 0 : index
    %93 = vector.load %arg10[%c0_33, %c0_34] : memref<1x32xf32, #tpu.memory_space<vmem>>, vector<1x32xf32>
    %cst_35 = arith.constant dense<0.000000e+00> : vector<8xf32>
    %94 = vector.multi_reduction <add>, %91, %cst_35 [1] : vector<8x32xf32> to vector<8xf32>
    %95 = vector.shape_cast %94 : vector<8xf32> to vector<8x1xf32>
    %cst_36 = arith.constant 3.200000e+01 : f32
    %96 = vector.broadcast %cst_36 : f32 to vector<8x1xf32>
    %97 = arith.divf %95, %96 : vector<8x1xf32>
    %98 = vector.broadcast %97 : vector<8x1xf32> to vector<8x32xf32>
    %99 = arith.subf %91, %98 : vector<8x32xf32>
    %100 = arith.mulf %99, %99 : vector<8x32xf32>
    %cst_37 = arith.constant dense<0.000000e+00> : vector<8xf32>
    %101 = vector.multi_reduction <add>, %100, %cst_37 [1] : vector<8x32xf32> to vector<8xf32>
    %102 = vector.shape_cast %101 : vector<8xf32> to vector<8x1xf32>
    %cst_38 = arith.constant 3.200000e+01 : f32
    %103 = vector.broadcast %cst_38 : f32 to vector<8x1xf32>
    %104 = arith.divf %102, %103 : vector<8x1xf32>
    %105 = vector.broadcast %97 : vector<8x1xf32> to vector<8x32xf32>
    %106 = arith.subf %91, %105 : vector<8x32xf32>
    %cst_39 = arith.constant 9.99999974E-6 : f32
    %107 = vector.broadcast %cst_39 : f32 to vector<8x1xf32>
    %108 = arith.addf %104, %107 : vector<8x1xf32>
    %109 = math.rsqrt %108 : vector<8x1xf32>
    %110 = vector.broadcast %109 : vector<8x1xf32> to vector<8x32xf32>
    %111 = arith.mulf %106, %110 : vector<8x32xf32>
    %112 = vector.broadcast %92 : vector<1x32xf32> to vector<8x32xf32>
    %113 = arith.mulf %111, %112 : vector<8x32xf32>
    %114 = vector.broadcast %93 : vector<1x32xf32> to vector<8x32xf32>
    %115 = arith.addf %113, %114 : vector<8x32xf32>
    %116 = arith.truncf %115 : vector<8x32xf32> to vector<8x32xbf16>
    %c0_40 = arith.constant 0 : index
    %c0_41 = arith.constant 0 : index
    %117 = vector.load %arg11[%c0_40, %c0_41] : memref<32x64xbf16, #tpu.memory_space<vmem>>, vector<32x64xbf16>
    %cst_42 = arith.constant dense<0.000000e+00> : vector<8x64xf32>
    %118 = tpu.matmul %116, %117, %cst_42 {dimension_numbers = #tpu.dot_dimension_numbers<[1], [0], [0], [1], [0, 0, 1, 1], [], []>} : vector<8x32xbf16>, vector<32x64xbf16>, vector<8x64xf32> -> vector<8x64xf32>
    %c0_43 = arith.constant 0 : index
    %c0_44 = arith.constant 0 : index
    %119 = vector.load %arg12[%c0_43, %c0_44] : memref<1x64xf32, #tpu.memory_space<vmem>>, vector<1x64xf32>
    %120 = vector.broadcast %119 : vector<1x64xf32> to vector<8x64xf32>
    %121 = arith.addf %118, %120 : vector<8x64xf32>
    %122 = arith.mulf %121, %121 : vector<8x64xf32>
    %123 = arith.mulf %121, %122 : vector<8x64xf32>
    %cst_45 = arith.constant 4.471500e-02 : f32
    %124 = vector.broadcast %cst_45 : f32 to vector<8x64xf32>
    %125 = arith.mulf %124, %123 : vector<8x64xf32>
    %126 = arith.addf %121, %125 : vector<8x64xf32>
    %cst_46 = arith.constant 0.797884583 : f32
    %127 = vector.broadcast %cst_46 : f32 to vector<8x64xf32>
    %128 = arith.mulf %127, %126 : vector<8x64xf32>
    %129 = math.tanh %128 : vector<8x64xf32>
    %cst_47 = arith.constant 1.000000e+00 : f32
    %130 = vector.broadcast %cst_47 : f32 to vector<8x64xf32>
    %131 = arith.addf %130, %129 : vector<8x64xf32>
    %cst_48 = arith.constant 5.000000e-01 : f32
    %132 = vector.broadcast %cst_48 : f32 to vector<8x64xf32>
    %133 = arith.mulf %132, %131 : vector<8x64xf32>
    %134 = arith.mulf %121, %133 : vector<8x64xf32>
    %135 = arith.truncf %134 : vector<8x64xf32> to vector<8x64xbf16>
    %c0_49 = arith.constant 0 : index
    %c0_50 = arith.constant 0 : index
    %136 = vector.load %arg13[%c0_49, %c0_50] : memref<64x32xbf16, #tpu.memory_space<vmem>>, vector<64x32xbf16>
    %cst_51 = arith.constant dense<0.000000e+00> : vector<8x32xf32>
    %137 = tpu.matmul %135, %136, %cst_51 {dimension_numbers = #tpu.dot_dimension_numbers<[1], [0], [0], [1], [0, 0, 1, 1], [], []>} : vector<8x64xbf16>, vector<64x32xbf16>, vector<8x32xf32> -> vector<8x32xf32>
    %c0_52 = arith.constant 0 : index
    %c0_53 = arith.constant 0 : index
    %138 = vector.load %arg14[%c0_52, %c0_53] : memref<1x32xf32, #tpu.memory_space<vmem>>, vector<1x32xf32>
    %139 = vector.broadcast %138 : vector<1x32xf32> to vector<8x32xf32>
    %140 = arith.addf %137, %139 : vector<8x32xf32>
    %141 = arith.addf %91, %140 : vector<8x32xf32>
    %c0_54 = arith.constant 0 : index
    %c0_55 = arith.constant 0 : index
    %c0_56 = arith.constant 0 : index
    %142 = vector.load %arg15[%c0_54, %c0_55, %c0_56] : memref<1x8x32xf32, #tpu.memory_space<vmem>>, vector<1x8x32xf32>
    %143 = vector.shape_cast %142 : vector<1x8x32xf32> to vector<8x32xf32>
    %144 = vector.shape_cast %141 : vector<8x32xf32> to vector<1x8x32xf32>
    tpu.vector_store %arg15[%c0_54, %c0_55, %c0_56], %144 {strides = array<i32>} : memref<1x8x32xf32, #tpu.memory_space<vmem>>, vector<1x8x32xf32>,
    return
  }
  func.func @transform_0(%arg0: i32, %arg1: i32) -> (i32, i32, i32) {
    %c0_i32 = arith.constant 0 : i32
    %c0_i32_0 = arith.constant 0 : i32
    %c0_i32_1 = arith.constant 0 : i32
    return %arg0, %c0_i32, %c0_i32_0 : i32, i32, i32
  }
  func.func @transform_1(%arg0: i32, %arg1: i32) -> (i32, i32) {
    %c0_i32 = arith.constant 0 : i32
    %c0_i32_0 = arith.constant 0 : i32
    %c0_i32_1 = arith.constant 0 : i32
    return %c0_i32, %c0_i32_0 : i32, i32
  }
  func.func @transform_2(%arg0: i32, %arg1: i32) -> (i32, i32) {
    %c0_i32 = arith.constant 0 : i32
    %c0_i32_0 = arith.constant 0 : i32
    %c0_i32_1 = arith.constant 0 : i32
    return %c0_i32, %c0_i32_0 : i32, i32
  }
  func.func @transform_3(%arg0: i32, %arg1: i32) -> (i32, i32) {
    %c0_i32 = arith.constant 0 : i32
    %c0_i32_0 = arith.constant 0 : i32
    %c0_i32_1 = arith.constant 0 : i32
    return %c0_i32, %c0_i32_0 : i32, i32
  }
  func.func @transform_4(%arg0: i32, %arg1: i32) -> (i32, i32) {
    %c0_i32 = arith.constant 0 : i32
    %c0_i32_0 = arith.constant 0 : i32
    %c0_i32_1 = arith.constant 0 : i32
    return %c0_i32, %c0_i32_0 : i32, i32
  }
  func.func @transform_5(%arg0: i32, %arg1: i32) -> (i32, i32) {
    %c0_i32 = arith.constant 0 : i32
    %c0_i32_0 = arith.constant 0 : i32
    %c0_i32_1 = arith.constant 0 : i32
    return %c0_i32, %c0_i32_0 : i32, i32
  }
  func.func @transform_6(%arg0: i32, %arg1: i32) -> (i32, i32) {
    %c0_i32 = arith.constant 0 : i32
    %c0_i32_0 = arith.constant 0 : i32
    %c0_i32_1 = arith.constant 0 : i32
    return %c0_i32, %c0_i32_0 : i32, i32
  }
  func.func @transform_7(%arg0: i32, %arg1: i32) -> (i32, i32) {
    %c0_i32 = arith.constant 0 : i32
    %c0_i32_0 = arith.constant 0 : i32
    %c0_i32_1 = arith.constant 0 : i32
    return %c0_i32, %c0_i32_0 : i32, i32
  }
  func.func @transform_8(%arg0: i32, %arg1: i32) -> (i32, i32) {
    %c0_i32 = arith.constant 0 : i32
    %c0_i32_0 = arith.constant 0 : i32
    %c0_i32_1 = arith.constant 0 : i32
    return %c0_i32, %c0_i32_0 : i32, i32
  }
  func.func @transform_9(%arg0: i32, %arg1: i32) -> (i32, i32) {
    %c0_i32 = arith.constant 0 : i32
    %c0_i32_0 = arith.constant 0 : i32
    %c0_i32_1 = arith.constant 0 : i32
    return %c0_i32, %c0_i32_0 : i32, i32
  }
  func.func @transform_10(%arg0: i32, %arg1: i32) -> (i32, i32) {
    %c0_i32 = arith.constant 0 : i32
    %c0_i32_0 = arith.constant 0 : i32
    %c0_i32_1 = arith.constant 0 : i32
    return %c0_i32, %c0_i32_0 : i32, i32
  }
  func.func @transform_11(%arg0: i32, %arg1: i32) -> (i32, i32) {
    %c0_i32 = arith.constant 0 : i32
    %c0_i32_0 = arith.constant 0 : i32
    %c0_i32_1 = arith.constant 0 : i32
    return %c0_i32, %c0_i32_0 : i32, i32
  }
  func.func @transform_12(%arg0: i32, %arg1: i32) -> (i32, i32) {
    %c0_i32 = arith.constant 0 : i32
    %c0_i32_0 = arith.constant 0 : i32
    %c0_i32_1 = arith.constant 0 : i32
    return %c0_i32, %c0_i32_0 : i32, i32
  }
  func.func @transform_13(%arg0: i32, %arg1: i32) -> (i32, i32, i32) {
    %c0_i32 = arith.constant 0 : i32
    %c0_i32_0 = arith.constant 0 : i32
    return %arg0, %arg1, %c0_i32 : i32, i32, i32
  }
}

</mosaic_0001>

<bundles_post_ra>
// kernel: tpu_custom_call.1
= control target key start
LH: loop header
LB: loop body
LE: loop exit
PB: predicated region body
PF: predicated region fallthrough
CT: control target
= control target key end

     0   :  { %s3029_s0 = inlined_call_operand.vmem [shape: f32[2,16,32], index: 0, kind: input, shape index: {}]   ;;  %s3030_s1 = inlined_call_operand.hbm [shape: f32[1,32], index: 1, kind: input, shape index: {}]   ;;  %s3031_s2 = inlined_call_operand.vmem [shape: f32[1,32], index: 2, kind: input, shape index: {}]   ;;  %s3032_s3 = inlined_call_operand.vmem [shape: bf16[32,32], index: 3, kind: input, shape index: {}]   ;;  %s3033_s4 = inlined_call_operand.vmem [shape: f32[1,32], index: 4, kind: input, shape index: {}]   ;;  %s3034_s5 = inlined_call_operand.hbm [shape: bf16[32,64], index: 5, kind: input, shape index: {}]   ;;  %s3035_s6 = inlined_call_operand.vmem [shape: f32[1,64], index: 6, kind: input, shape index: {}]   ;;  %s3036_s7 = inlined_call_operand.vmem [shape: f32[1,32], index: 7, kind: input, shape index: {}]   ;;  %s3037_s8 = inlined_call_operand.vmem [shape: f32[1,32], index: 8, kind: input, shape index: {}]   ;;  %s3038_s9 = inlined_call_operand.hbm [shape: bf16[32,64], index: 9, kind: input, shape index: {}]   ;;  %s3039_s10 = inlined_call_operand.vmem [shape: f32[1,64], index: 10, kind: input, shape index: {}]   ;;  %s3040_s11 = inlined_call_operand.vmem [shape: bf16[64,32], index: 11, kind: input, shape index: {}]   ;;  %s3041_s12 = inlined_call_operand.vmem [shape: f32[1,32], index: 12, kind: input, shape index: {}]   ;;  %s3042_s13 = inlined_call_operand.hbm [shape: f32[2,16,32], index: 13, kind: output, shape index: {}]  }
   0x1   :  { %3055 = sst [smem:[#allocation22_spill]] %s3034_s5 }
   0x2   :  { %3056 = sst [smem:[#allocation23_spill]] %s3041_s12 }
   0x3   :  { %3057 = sst [smem:[#allocation24_spill]] %s3042_s13 }
   0x4   :  { %18 = vsyncpa [#allocation3], 0 }
   0x5   :  { %19 = vsyncpa [#allocation6], 0 }
   0x6   :  { %20 = vsyncpa [#allocation4], 0 }
   0x7   :  { %22 = vsyncpa [#allocation4 + $0x1], 0  ;;  %s2461_s25 = smov 0   ;;  %s2463_s26 = smov 0  }
   0x8   :  { %s2465_s27 = smov 0   ;;  %s2467_s28 = smov 0  }
   0x9   :  { %s2469_s29 = smov 0   ;;  %s2471_s30 = smov 0  }
   0xa   :  { %s2473_s14 = smov 0   ;;  %s2475_s15 = smov 0  }
   0xb LB: > { %3058 = sst [smem:[#allocation12_spill]] %s2346_s25  ;;  %s1913_s16 = sadd.s32 4294967295, %s2374_s15   ;;  %s2374_s15 = sphi %s2475_s15, %s28_s15   ;;  %s2370_s14 = sphi %s2473_s14, %s3085_s14   ;;  %s2366_s30 = sphi %s2471_s30, %s3084_s30   ;;  %s2362_s29 = sphi %s2469_s29, %s3083_s29   ;;  %s2358_s28 = sphi %s2467_s28, %s3082_s28   ;;  %s2354_s27 = sphi %s2465_s27, %s3081_s27   ;;  %s2350_s26 = sphi %s2463_s26, %s3087_s26   ;;  %s2346_s25 = sphi %s2461_s25, %s3086_s25  }
   0xc   : > { %3059 = sst [smem:[#allocation13_spill]] %s2354_s27  ;;  %s1914_s17 = sadd.s32 4294967294, %s2374_s15  }
   0xd   : > { %3060 = sst [smem:[#allocation14_spill]] %s2366_s30  ;;  %s37_s18 = sadd.s32 1, %s2366_s30 }
   0xe   : > { %3061 = sst [smem:[#allocation15_spill]] %s2370_s14  ;;  %s40_s19 = sadd.s32 1, %s2370_s14 }
   0xf   : > { %3062 = sst [smem:[#allocation16_spill]] %s2374_s15  ;;  %p38_p0 = scmp.ge.s32.totalorder %s37_s18, 2 }
  0x10   : > { %s327_s20 = sadd.s32 1, %s2354_s27  ;;  %p337_p1 = scmp.ne.s32.totalorder %s2354_s27, %s2350_s26 }
  0x11   : > { %p338_p2 = scmp.eq.s32.totalorder %s1913_s16, 3  ;;  %s3089_s18 = smov (%p38_p0, %s37_s18), 0 }
  0x12   : > { %3063 = sst [smem:[#allocation17_spill]] %s3089_s18  ;;  %s3091_s19 = smov (!%p38_p0, %s40_s19), %s2370_s14 }
  0x13   : > { %s323_s21 = ssub.s32 %s2366_s30, %s3089_s18  ;;  %p2513_p3 = por %p338_p2, %p337_p1 }
  0x14   : > { %p42_p4 = scmp.ge.s32.totalorder %s3091_s19, 2  ;;  %p343_p5 = scmp.ne.s32.totalorder %s2350_s26, %s2346_s25 }
  0x15   : > { %s3064_s22 = scalar_select %p2513_p3, 1, 0 }
  0x16   : > { %p344_p6 = scmp.eq.s32.totalorder %s1914_s17, 3  ;;  %p1915_p7 = scmp.ge.s32.totalorder %s2374_s15, 1 }
  0x17   : > { %3065 = sst [smem:[#allocation18_spill]] %s3064_s22  ;;  %s3093_s19 = smov (%p42_p4, %s3091_s19), 0 }
  0x18   : > { %3066 = sst [smem:[#allocation19_spill]] %s3093_s19  ;;  %p2522_p8 = por %p344_p6, %p343_p5 }
  0x19   : > { %p351_p9 = scmp.lt.s32.totalorder %s2374_s15, 5  ;;  %s322_s24 = ssub.s32 %s2370_s14, %s3093_s19 }
  0x1a   : > { %s3067_s23 = scalar_select %p2522_p8, 1, 0 }
  0x1b   : > { %s324_s13 = sor.u32 %s323_s21, %s322_s24  ;;  %p2529_p10 = pnand %p1915_p7, %p351_p9 }
  0x1c   : > { %3068 = sst [smem:[#allocation20_spill]] %s3067_s23  ;;  %p325_p11 = scmp.eq.s32.totalorder %s324_s13, 0 }
  0x1d   : > { %p2533_p12 = scmp.eq.s32.totalorder %s1913_s16, 0  ;;  %p2010_p13 = pneg %p2529_p10 }
  0x1e   : > { %s3071_s5 = sld [smem:[#allocation22_spill]]  ;;  %s2376_s13 = smov [#allocation5]  }
  0x1f   : > { %s2543_s15 = scalar_select %p325_p11, %s2354_s27, %s327_s20  }
  0x20   : > { %p2547_p0 = pnand %p2533_p12, %p2010_p13  ;;  %s385_s16 = sshll.u32 %s2376_s13, 4  ;;  %s386_s16 = int_to_ptr.vmem [resolvable:$true] %s385_s16 }
  0x21   : > { %3072 = sst [smem:[#allocation21_spill]] %s2543_s15  ;;  %s2377_s24 = smov 64  }
  0x22   : > { %s2378_s19 = smov 4   ;;  %s363_s20 = sshll.u32 %s3030_s1, 4  ;;  %s364_s20 = int_to_ptr.hbm [resolvable:$true] %s363_s20 }
  0x23   : > { %s406_s22 = sshll.u32 %s3038_s9, 4  ;;  %s2380_s13 = smov [#allocation7]   ;;  %s407_s22 = int_to_ptr.hbm [resolvable:$true] %s406_s22 }
  0x24   : > { %s383_s23 = sshll.u32 %s3071_s5, 4  ;;  %s2379_s5 = smov [#allocation2]   ;;  %s384_s23 = int_to_ptr.hbm [resolvable:$true] %s383_s23 }
  0x25   : > { %2016 = dma.hbm_to_vmem [thread:$0]  (!%p2547_p0), %s384_s23, 256, %s386_s16, [#allocation6], %s2377_s24, %s2377_s24, %s2378_s19  }
  0x26   : > { %s365_s14 = sshll.u32 %s2379_s5, 4  ;;  %s408_s12 = sshll.u32 %s2380_s13, 4  ;;  %s366_s14 = int_to_ptr.vmem [resolvable:$true] %s365_s14  ;;  %s409_s12 = int_to_ptr.vmem [resolvable:$true] %s408_s12 }
  0x27   : > { %2013 = dma.hbm_to_vmem [thread:$0]  (!%p2547_p0), %s364_s20, 16, %s366_s14, [#allocation3]  }
  0x28   : > { %2019 = dma.hbm_to_vmem [thread:$0]  (!%p2547_p0), %s407_s22, 256, %s409_s12, [#allocation6], %s2377_s24, %s2377_s24, %s2378_s19  }
  0x29   : > { %441 = sbr.rel (%p2529_p10) target bundleno = 1881 (0x759), region = 72 }
  0x2e   : > { %2333 = dma.done.wait (%p2533_p12), [#allocation3], 16  }
  0x2f   : > { %2335 = vsyncadd (%p2533_p12), [#allocation3], 4294967280 }
  0x30   : > { %2337 = dma.done.wait (%p2533_p12), [#allocation6], 512  }
  0x31   : > { %2339 = vsyncadd (%p2533_p12), [#allocation6], 4294966784  ;;  %p496_p1 = scmp.lt.s32.totalorder %s2362_s29, 1  ;;  %s1927_s12 = sshll.u32 %s2358_s28, 3  ;;  %vm509_vm0 = vcmask 261120   ;;  %v2381_v6 = vmov 32.0  }
  0x32   : > { %2153 = vrcp.f32 %v2381_v6  ;;  %v1989_v28 = vld [vmem:[#allocation5 + $0x8] sm:$0xff]  ;;  %v1988_v31 = vld [vmem:[#allocation5] sm:$0xff]  ;;  %v2145_v55 = vld [vmem:[#allocation2] ss:$0 sm:$0xff]  ;;  %s2382_s20 = smov 104   ;;  %s2383_s13 = smov 112  }
  0x33   : > { %s497_s5 = scalar_select %p496_p1, %s2362_s29, 1  ;;  %662 = vmatpush.bf16.msra.mxu1 %v1989_v28  ;;  %v1987_v33 = vld [vmem:[%s3032_s3 + $0x8] sm:$0xff]  ;;  %v1986_v35 = vld [vmem:[%s3032_s3] sm:$0xff]  ;;  %vm681_vm11 = vcmask 1047556   ;;  %vm1300_vm12 = vcmask 64512   ;;  %vm1392_vm13 = vcmask 130048  }
  0x34   : > { %625 = vmatpush.bf16.msra.mxu0 %v1987_v33  ;;  %v2146_v62 = vld [vmem:[%s3031_s2] ss:$0 sm:$0xff]  ;;  %s2385_s14 = smov 96   ;;  %s2388_s15 = smov 24   ;;  %vm1653_vm14 = vcmask 195584  }
  0x35   : > { %s1985_s27 = sshll.u32 %s497_s5, 4  ;;  %s2384_s5 = smov 120  }
  0x36   : > { %s500_s18 = scalar_lea.vmem %s3029_s0, %s1985_s27  ;;  %s2390_s30 = smov 8  }
  0x37   : > { %s2579_s19 = scalar_lea.vmem %s500_s18, %s1927_s12  ;;  %v503_v0 = vld [vmem:[%s500_s18] sm:$0xff]  ;;  %v504_v4 = vld [vmem:[%s500_s18 + $0x8] sm:$0xff]  ;;  %663 = vmatpush.bf16.msra.mxu1 %v1988_v31  ;;  %s2389_s18 = smov 16  }
  0x38   : > { %v506_v1 = vld [vmem:[%s2579_s19] sm:$0xff]  ;;  %v510_v2 = vsel %vm509_vm0, %v503_v0, 0.0  ;;  %v513_v5 = vsel %vm509_vm0, %v504_v4, 0.0  ;;  %v2154_v7 = vpop.eup %2153  ;;  %626 = vmatpush.bf16.msra.mxu0 %v1986_v35  ;;  %s3074_s16 = sld [smem:[#allocation23_spill]] }
  0x39   : > { %v571_v3 = vsel %vm509_vm0, %v506_v1, 0.0  ;;  %511 = vadd.xlane.f32.xlu0 %v510_v2  ;;  %v517_v8 = vmul.f32 32.0, %v2154_v7  ;;  %vm521_vm1 = vweird.f32 %v2154_v7  ;;  %s3075_s17 = sld [smem:[#allocation24_spill]] }
  0x3a   : > { %572 = vadd.xlane.f32.xlu1 %v571_v3 }
  0x3b   : > { %v518_v9 = vsub.f32 1.0, %v517_v8 }
  0x3d   : > { %v519_v10 = vmul.f32 %v2154_v7, %v518_v9 }
  0x3f   : > { %v520_v11 = vadd.f32 %v2154_v7, %v519_v10 }
  0x41   : > { %514 = vadd.xlane.f32.xlu0 %v513_v5  ;;  %v2585_v12 = vsel %vm521_vm1, %v2154_v7, %v520_v11 }
  0xac   : > { %v512_v13 = vpop.xlane.xlu0 %511 }
  0xad   : > { %v523_v14 = vmul.f32 %v2585_v12, %v512_v13  ;;  %v573_v17 = vpop.xlane.xlu1 %572  ;;  %v2147_v13 = vld [vmem:[%s3035_s6] ss:$0 sm:$0xff] }
  0xae   : > { %v574_v21 = vmul.f32 %v573_v17, %v2585_v12 }
  0xaf   : > { %v525_v15 = vsub.f32 %v503_v0, %v523_v14 }
  0xb0   : > { %v2591_v23 = vsub.f32 %v506_v1, %v574_v21 }
  0xb1   : > { %v527_v16 = vmul.f32 %v525_v15, %v525_v15 }
  0xb2   : > { %v576_v26 = vmul.f32 %v2591_v23, %v2591_v23 }
  0xb3   : > { %v529_v18 = vsel %vm509_vm0, %v527_v16, 0.0 }
  0xb4   : > { %530 = vadd.xlane.f32.xlu1 %v529_v18  ;;  %v515_v19 = vpop.xlane.xlu0 %514  ;;  %v577_v27 = vsel %vm509_vm0, %v576_v26, 0.0 }
  0xb5   : > { %v524_v20 = vmul.f32 %v2585_v12, %v515_v19  ;;  %v2148_v19 = vld [vmem:[%s3033_s4] ss:$0 sm:$0xff] }
  0xb7   : > { %v526_v22 = vsub.f32 %v504_v4, %v524_v20 }
  0xb9   : > { %v528_v24 = vmul.f32 %v526_v22, %v526_v22 }
  0xbb   : > { %v532_v25 = vsel %vm509_vm0, %v528_v24, 0.0 }
  0xbc   : > { %533 = vadd.xlane.f32.xlu2 %v532_v25  ;;  %v2386_v25 = vmov 1983009808  }
  0xbd   : > { %v686_v26 = vunpack.c.l.s4 %v2386_v25 }
  0xc4   : > { %578 = vadd.xlane.f32.xlu2 %v577_v27 }
 0x127   : > { %v531_v29 = vpop.xlane.xlu1 %530 }
 0x128   : > { %v535_v30 = vmul.f32 %v531_v29, %v2585_v12  ;;  %v2623_v29 = vunpack.c.0.s8 %v686_v26 }
 0x12a   : > { %v537_v32 = vadd.f32 1e-05, %v535_v30 }
 0x12c   : > { %2155 = vrsqrt.f32 %v537_v32  ;;  %vm545_vm3 = vweird.f32 %v537_v32 }
 0x12f   : > { %v534_v34 = vpop.xlane.xlu2 %533 }
 0x130   : > { %v536_v36 = vmul.f32 %v534_v34, %v2585_v12 }
 0x132   : > { %v2156_v37 = vpop.eup %2155  ;;  %v538_v38 = vadd.f32 1e-05, %v536_v36 }
 0x133   : > { %v540_v39 = vmul.f32 %v2156_v37, %v537_v32  ;;  %vm546_vm2 = vweird.f32 %v2156_v37  ;;  %v2387_v32 = vmov 1934713408  }
 0x134   : > { %2157 = vrsqrt.f32 %v538_v38  ;;  %vm547_vm4 = vmor %vm545_vm3, %vm546_vm2  ;;  %vm555_vm6 = vweird.f32 %v538_v38  ;;  %v710_v33 = vunpack.c.l.s4 %v2387_v32  ;;  %vm1771_vm3 = vcmask 523264  }
 0x135   : > { %v541_v40 = vmul.f32 %v2156_v37, %v540_v39 }
 0x136   : > { %v2632_v39 = vunpack.c.0.s8 %v710_v33 }
 0x137   : > { %v542_v41 = vmul.f32 0.5, %v541_v40  ;;  %v579_v42 = vpop.xlane.xlu2 %578 }
 0x138   : > { %v580_v43 = vmul.f32 %v579_v42, %v2585_v12 }
 0x139   : > { %v543_v44 = vsub.f32 1.5, %v542_v41 }
 0x13a   : > { %v2158_v45 = vpop.eup %2157  ;;  %v581_v46 = vadd.f32 1e-05, %v580_v43 }
 0x13b   : > { %v544_v47 = vmul.f32 %v2156_v37, %v543_v44  ;;  %v550_v48 = vmul.f32 %v2158_v45, %v538_v38  ;;  %vm556_vm5 = vweird.f32 %v2158_v45 }
 0x13c   : > { %2159 = vrsqrt.f32 %v581_v46  ;;  %vm557_vm7 = vmor %vm555_vm6, %vm556_vm5  ;;  %vm588_vm8 = vweird.f32 %v581_v46 }
 0x13d   : > { %v551_v49 = vmul.f32 %v2158_v45, %v550_v48  ;;  %v548_v50 = vsel %vm547_vm4, %v2156_v37, %v544_v47 }
 0x13e   : > { %v559_v54 = vmul.f32 %v548_v50, %v525_v15 }
 0x13f   : > { %v552_v51 = vmul.f32 0.5, %v551_v49 }
 0x140   : > { %v564_v61 = vmul.f32 %v2145_v55, %v559_v54 }
 0x141   : > { %v553_v52 = vsub.f32 1.5, %v552_v51 }
 0x142   : > { %v2160_v53 = vpop.eup %2159  ;;  %v569_v2 = vadd.f32 %v2146_v62, %v564_v61 }
 0x143   : > { %v554_v56 = vmul.f32 %v2158_v45, %v553_v52  ;;  %v583_v57 = vmul.f32 %v2160_v53, %v581_v46  ;;  %vm589_vm9 = vweird.f32 %v2160_v53 }
 0x144   : > { %vm590_vm10 = vmor %vm588_vm8, %vm589_vm9 }
 0x145   : > { %v558_v58 = vsel %vm557_vm7, %v2158_v45, %v554_v56  ;;  %v584_v59 = vmul.f32 %v2160_v53, %v583_v57 }
 0x146   : > { %v560_v60 = vmul.f32 %v558_v58, %v526_v22 }
 0x147   : > { %v585_v63 = vmul.f32 0.5, %v584_v59 }
 0x148   : > { %v565_v0 = vmul.f32 %v2145_v55, %v560_v60 }
 0x149   : > { %v586_v1 = vsub.f32 1.5, %v585_v63 }
 0x14a   : > { %v570_v3 = vadd.f32 %v2146_v62, %v565_v0 }
 0x14b   : > { %v587_v4 = vmul.f32 %v2160_v53, %v586_v1 }
 0x14c   : > { %v632_v5 = vpack.c.bf16 %v570_v3, %v569_v2 }
 0x14d   : > { %v591_v6 = vsel %vm590_vm10, %v2160_v53, %v587_v4 }
 0x14e   : > { %1945 = vmatmul.msk.bf16.vlgmr.msra.gmra.mxu1 %vm509_vm0, %v632_v5  ;;  %v592_v7 = vmul.f32 %v591_v6, %v2591_v23 }
 0x150   : > { %v593_v8 = vmul.f32 %v2145_v55, %v592_v7 }
 0x152   : > { %v594_v9 = vadd.f32 %v2146_v62, %v593_v8 }
 0x154   : > { %v595_v10 = vpack.c.bf16 %v594_v9, %v594_v9 }
 0x156   : > { %1936 = vmatmul.msk.bf16.vlgmr.msra.gmra.mxu0 %vm509_vm0, %v595_v10 }
 0x1cb   : > { %v665_v11 = vpop.f32.mrf.mxu1 }
 0x1cc   : > { %v666_v16 = vadd.f32 %v2147_v13, %v665_v11 }
 0x1ce   : > { %v817_v38 = vrot.slane %v666_v16, 4 }
 0x1d3   : > { %v628_v14 = vpop.f32.mrf.mxu0  ;;  %v667_v15 = vpop.f32.mrf.mxu1 }
 0x1d4   : > { %v668_v17 = vadd.f32 %v2147_v13, %v667_v15  ;;  %v629_v21 = vadd.f32 %v2148_v19, %v628_v14 }
 0x1d6   : > { %v2120_v18 = vpack.i.bf16 %v668_v17, %v666_v16  ;;  %v683_v28 = vrot.slane %v629_v21, 4  ;;  %v873_v36 = vrot.slane %v668_v17, 4 }
 0x1d8   : > { %2121 = vrot.lane.b32.xlu2 %v2120_v18, %s2382_s20  ;;  %2116 = vrot.lane.b32.xlu1 %v2120_v18, %s2383_s13 }
 0x1d9   : > { %2111 = vrot.lane.b32.xlu0 %v2120_v18, %s2384_s5 }
 0x1db   : > { %v630_v20 = vpop.f32.mrf.mxu0 }
 0x1e0   : > { %677 = vrot.lane.b32.xlu1 %v629_v21, %s2382_s20  ;;  %674 = vrot.lane.b32.xlu2 %v629_v21, %s2383_s13 }
 0x1e1   : > { %671 = vrot.lane.b32.xlu0 %v629_v21, %s2384_s5 }
 0x1e8   : > { %2126 = vrot.lane.b32.xlu2 %v2120_v18, %s2385_s14 }
 0x232   : > { %v2619_v22 = vpop.permute.xlu2 %2121 }
 0x233   : > { %v2124_v23 = vunpack.i.h.bf16 %v2619_v22  ;;  %v2123_v24 = vunpack.i.l.bf16 %v2619_v22 }
 0x235   : > { %v883_v40 = vrot.slane %v2124_v23, 4  ;;  %v827_v41 = vrot.slane %v2123_v24, 4 }
 0x23a   : > { %v675_v27 = vpop.permute.xlu2 %674 }
 0x23b   : > { %v680_v30 = vrot.slane %v675_v27, 4  ;;  %v684_v31 = vsel %vm681_vm11, %v675_v27, %v683_v28 }
 0x23c   : > { %v2627_v34 = vperm.slane %v684_v31, %v2623_v29 }
 0x23d   : > { %v682_v35 = vsel %vm681_vm11, %v680_v30, %v629_v21 }
 0x23e   : > { %v2639_v45 = vperm.slane %v682_v35, %v2623_v29  ;;  %v719_v46 = vrot.slane %v2627_v34, 4 }
 0x24a   : > { %v2630_v37 = vpop.permute.xlu1 %2116 }
 0x24b   : > { %v2119_v42 = vunpack.i.h.bf16 %v2630_v37  ;;  %v2118_v43 = vunpack.i.l.bf16 %v2630_v37  ;;  %v2636_v44 = vpop.permute.xlu0 %2111 }
 0x24c   : > { %v2114_v47 = vunpack.i.h.bf16 %v2636_v44  ;;  %v2113_v48 = vunpack.i.l.bf16 %v2636_v44 }
 0x24d   : > { %v871_v49 = vrot.slane %v2119_v42, 4  ;;  %v874_v50 = vsel %vm681_vm11, %v2119_v42, %v873_v36  ;;  %v815_v51 = vrot.slane %v2118_v43, 4  ;;  %v818_v52 = vsel %vm681_vm11, %v2118_v43, %v817_v38 }
 0x24e   : > { %v882_v53 = vperm.slane %v874_v50, %v2623_v29  ;;  %v826_v54 = vperm.slane %v818_v52, %v2623_v29  ;;  %v885_v55 = vrot.slane %v2114_v47, 4  ;;  %v828_v56 = vsel %vm681_vm11, %v827_v41, %v2113_v48 }
 0x24f   : > { %v872_v57 = vsel %vm681_vm11, %v871_v49, %v668_v17  ;;  %v816_v58 = vsel %vm681_vm11, %v815_v51, %v666_v16  ;;  %v829_v59 = vrot.slane %v2113_v48, 4  ;;  %v834_v60 = vperm.slane %v828_v56, %v2623_v29 }
 0x250   : > { %v878_v61 = vperm.slane %v872_v57, %v2623_v29  ;;  %v909_v62 = vrot.slane %v882_v53, 4  ;;  %v822_v63 = vperm.slane %v816_v58, %v2623_v29  ;;  %v853_v0 = vrot.slane %v826_v54, 4 }
 0x251   : > { %v830_v1 = vsel %vm681_vm11, %v2123_v24, %v829_v59  ;;  %v839_v2 = vrot.slane %v834_v60, 4  ;;  %v884_v3 = vsel %vm681_vm11, %v883_v40, %v2114_v47  ;;  %v886_v4 = vsel %vm681_vm11, %v2124_v23, %v885_v55 }
 0x252   : > { %v897_v5 = vrot.slane %v878_v61, 4  ;;  %v841_v6 = vrot.slane %v822_v63, 4  ;;  %v838_v7 = vperm.slane %v830_v1, %v2623_v29  ;;  %v890_v8 = vperm.slane %v884_v3, %v2623_v29  ;;  %v678_v9 = vpop.permute.xlu1 %677 }
 0x253   : > { %v840_v10 = vsel %vm681_vm11, %v839_v2, %v822_v63  ;;  %v894_v11 = vperm.slane %v886_v4, %v2623_v29  ;;  %v693_v13 = vrot.slane %v678_v9, 4  ;;  %v672_v43 = vpop.permute.xlu0 %671  ;;  %v707_v47 = vrot.slane %v2639_v45, 4 }
 0x254   : > { %v842_v14 = vsel %vm681_vm11, %v834_v60, %v841_v6  ;;  %v846_v15 = vperm.slane %v840_v10, %v2632_v39  ;;  %v851_v16 = vrot.slane %v838_v7, 4  ;;  %v854_v17 = vsel %vm681_vm11, %v838_v7, %v853_v0 }
 0x255   : > { %v850_v18 = vperm.slane %v842_v14, %v2632_v39  ;;  %v862_v19 = vperm.slane %v854_v17, %v2632_v39  ;;  %v895_v20 = vrot.slane %v890_v8, 4  ;;  %v898_v21 = vsel %vm681_vm11, %v890_v8, %v897_v5 }
 0x256   : > { %v852_v23 = vsel %vm681_vm11, %v851_v16, %v826_v54  ;;  %v863_v24 = vrot.slane %v846_v15, 4  ;;  %v906_v25 = vperm.slane %v898_v21, %v2632_v39  ;;  %v907_v26 = vrot.slane %v894_v11, 4 }
 0x257   : > { %v858_v27 = vperm.slane %v852_v23, %v2632_v39  ;;  %v865_v28 = vrot.slane %v850_v18, 4  ;;  %v869_v30 = vrot.slane %v862_v19, 4  ;;  %v896_v31 = vsel %vm681_vm11, %v895_v20, %v878_v61 }
 0x258   : > { %v902_v32 = vperm.slane %v896_v31, %v2632_v39  ;;  %v908_v33 = vsel %vm681_vm11, %v907_v26, %v882_v53  ;;  %v910_v35 = vsel %vm681_vm11, %v894_v11, %v909_v62  ;;  %v921_v36 = vrot.slane %v906_v25, 4 }
 0x259   : > { %v866_v38 = vsel %vm681_vm11, 0.0, %v865_v28  ;;  %v867_v40 = vrot.slane %v858_v27, 4  ;;  %v870_v41 = vsel %vm681_vm11, 0.0, %v869_v30  ;;  %v2677_v42 = vperm.slane %v908_v33, %v2632_v39 }
 0x25a   : > { %v918_v48 = vperm.slane %v910_v35, %v2632_v39  ;;  %v919_v49 = vrot.slane %v902_v32, 4  ;;  %v922_v50 = vsel %vm681_vm11, 0.0, %v921_v36  ;;  %v927_v52 = vsel %vm681_vm11, %v865_v28, %v846_v15 }
 0x25b   : > { %v923_v51 = vrot.slane %v2677_v42, 4  ;;  %v932_v53 = vrot.slane %v866_v38, 4  ;;  %v943_v54 = vrot.slane %v870_v41, 4  ;;  %v981_v56 = vsel %vm681_vm11, %v921_v36, %v902_v32 }
 0x25c   : > { %v925_v55 = vrot.slane %v918_v48, 4  ;;  %v694_v57 = vsel %vm681_vm11, %v693_v13, %v672_v43  ;;  %v695_v58 = vrot.slane %v672_v43, 4  ;;  %v986_v59 = vrot.slane %v922_v50, 4 }
 0x25d   : > { %v700_v60 = vperm.slane %v694_v57, %v2623_v29  ;;  %v864_v61 = vsel %vm681_vm11, 0.0, %v863_v24  ;;  %v868_v62 = vsel %vm681_vm11, 0.0, %v867_v40  ;;  %v920_v1 = vsel %vm681_vm11, 0.0, %v919_v49 }
 0x25e   : > { %v926_v63 = vsel %vm681_vm11, 0.0, %v925_v55  ;;  %v696_v0 = vsel %vm681_vm11, %v678_v9, %v695_v58  ;;  %v924_v2 = vsel %vm681_vm11, 0.0, %v923_v51  ;;  %v931_v6 = vperm.slane %v927_v52, %v2623_v29 }
 0x25f   : > { %v704_v3 = vperm.slane %v696_v0, %v2623_v29  ;;  %v705_v4 = vrot.slane %v700_v60, 4  ;;  %v708_v5 = vsel %vm681_vm11, %v700_v60, %v707_v47  ;;  %v933_v8 = vsel %vm681_vm11, %v932_v53, %v864_v61 }
 0x260   : > { %v716_v7 = vperm.slane %v708_v5, %v2632_v39  ;;  %v938_v10 = vsel %vm681_vm11, %v869_v30, %v858_v27  ;;  %v944_v11 = vsel %vm681_vm11, %v943_v54, %v868_v62  ;;  %v937_v15 = vperm.slane %v933_v8, %v2623_v29 }
 0x261   : > { %v706_v9 = vsel %vm681_vm11, %v705_v4, %v2639_v45  ;;  %v717_v13 = vrot.slane %v704_v3, 4  ;;  %v720_v14 = vsel %vm681_vm11, %v704_v3, %v719_v46  ;;  %v942_v19 = vperm.slane %v938_v10, %v2623_v29 }
 0x262   : > { %v712_v16 = vperm.slane %v706_v9, %v2632_v39  ;;  %v728_v17 = vperm.slane %v720_v14, %v2632_v39  ;;  %v731_v18 = vrot.slane %v716_v7, 4  ;;  %v997_v20 = vrot.slane %v926_v63, 4 }
 0x263   : > { %v718_v21 = vsel %vm681_vm11, %v717_v13, %v2627_v34  ;;  %v948_v45 = vperm.slane %v944_v11, %v2623_v29  ;;  %v951_v23 = vrot.slane %v931_v6, 4  ;;  %v963_v31 = vrot.slane %v942_v19, 4 }
 0x264   : > { %v724_v24 = vperm.slane %v718_v21, %v2632_v39  ;;  %v729_v25 = vrot.slane %v712_v16, 4  ;;  %v732_v46 = vsel %vm681_vm11, 0.0, %v731_v18  ;;  %v735_v26 = vrot.slane %v728_v17, 4 }
 0x265   : > { %v737_v27 = vsel %vm681_vm11, %v731_v18, %v712_v16  ;;  %v742_v28 = vrot.slane %v732_v46, 4  ;;  %v952_v30 = vsel %vm681_vm11, %v937_v15, %v951_v23  ;;  %v985_v41 = vperm.slane %v981_v56, %v2623_v29 }
 0x266   : > { %v730_v32 = vsel %vm681_vm11, 0.0, %v729_v25  ;;  %v733_v33 = vrot.slane %v724_v24, 4  ;;  %v736_v34 = vsel %vm681_vm11, 0.0, %v735_v26  ;;  %v2719_v35 = vperm.slane %v737_v27, %v2623_v29 }
 0x267   : > { %v743_v36 = vsel %vm681_vm11, %v742_v28, %v730_v32  ;;  %v748_v38 = vsel %vm681_vm11, %v735_v26, %v724_v24  ;;  %v753_v40 = vrot.slane %v736_v34, 4  ;;  %v960_v49 = vperm.slane %v952_v30, %v2632_v39 }
 0x268   : > { %v734_v43 = vsel %vm681_vm11, 0.0, %v733_v33  ;;  %v2726_v47 = vperm.slane %v743_v36, %v2623_v29  ;;  %v2729_v48 = vperm.slane %v748_v38, %v2623_v29  ;;  %v761_v50 = vrot.slane %v2719_v35, 4 }
 0x269   : > { %v964_v51 = vsel %vm681_vm11, %v948_v45, %v963_v31  ;;  %v987_v52 = vsel %vm681_vm11, %v986_v59, %v920_v1  ;;  %v992_v53 = vsel %vm681_vm11, %v925_v55, %v2677_v42  ;;  %v998_v58 = vsel %vm681_vm11, %v997_v20, %v924_v2 }
 0x26a   : > { %v972_v54 = vperm.slane %v964_v51, %v2632_v39  ;;  %v991_v56 = vperm.slane %v987_v52, %v2623_v29  ;;  %v996_v57 = vperm.slane %v992_v53, %v2623_v29  ;;  %v754_v60 = vsel %vm681_vm11, %v753_v40, %v734_v43 }
 0x26b   : > { %v1002_v61 = vperm.slane %v998_v58, %v2623_v29  ;;  %v1005_v62 = vrot.slane %v985_v41, 4  ;;  %v949_v63 = vrot.slane %v937_v15, 4  ;;  %v961_v59 = vrot.slane %v948_v45, 4 }
 0x26c   : > { %v977_v0 = vrot.slane %v972_v54, 4  ;;  %v1017_v3 = vrot.slane %v996_v57, 4  ;;  %v1003_v1 = vrot.slane %v991_v56, 4  ;;  %v979_v5 = vrot.slane %v960_v49, 4 }
 0x26d   : > { %v1006_v42 = vsel %vm681_vm11, %v991_v56, %v1005_v62  ;;  %v950_v55 = vsel %vm681_vm11, %v949_v63, %v931_v6  ;;  %v1015_v4 = vrot.slane %v1002_v61, 4  ;;  %v962_v13 = vsel %vm681_vm11, %v961_v59, %v942_v19 }
 0x26e   : > { %v978_v7 = vsel %vm681_vm11, %v977_v0, %v960_v49  ;;  %v1014_v2 = vperm.slane %v1006_v42, %v2632_v39  ;;  %v1018_v8 = vsel %vm681_vm11, %v1002_v61, %v1017_v3  ;;  %v956_v10 = vperm.slane %v950_v55, %v2632_v39 }
 0x26f   : > { %v1026_v11 = vperm.slane %v1018_v8, %v2632_v39  ;;  %v1039_v9 = vpack.c.bf16 %v978_v7, %v978_v7  ;;  %v1004_v14 = vsel %vm681_vm11, %v1003_v1, %v985_v41  ;;  %v968_v6 = vperm.slane %v962_v13, %v2632_v39 }
 0x270   : > { %v1010_v15 = vperm.slane %v1004_v14, %v2632_v39  ;;  %v1016_v16 = vsel %vm681_vm11, %v1015_v4, %v996_v57  ;;  %v980_v17 = vsel %vm681_vm11, %v972_v54, %v979_v5  ;;  %v1033_v45 = vrot.slane %v1014_v2, 4 }
 0x271   : > { %v1031_v18 = vrot.slane %v1026_v11, 4  ;;  %v1346_v20 = vunpack.c.l.b16 %v1039_v9  ;;  %v1022_v21 = vperm.slane %v1016_v16, %v2632_v39  ;;  %v973_v23 = vrot.slane %v968_v6, 4 }
 0x272   : > { %v1041_v24 = vpack.c.bf16 %v980_v17, %v980_v17  ;;  %v975_v25 = vrot.slane %v956_v10, 4  ;;  %v1029_v46 = vrot.slane %v1010_v15, 4  ;;  %v1034_v27 = vsel %vm681_vm11, %v1026_v11, %v1033_v45 }
 0x273   : > { %v1032_v19 = vsel %vm681_vm11, %v1031_v18, %v1014_v2  ;;  %v1027_v26 = vrot.slane %v1022_v21, 4  ;;  %v758_v28 = vperm.slane %v754_v60, %v2623_v29  ;;  %v974_v31 = vsel %vm681_vm11, %v973_v23, %v956_v10 }
 0x274   : > { %v1040_v30 = vpack.c.bf16 %v1032_v19, %v1032_v19  ;;  %v1042_v32 = vpack.c.bf16 %v1034_v27, %v1034_v27  ;;  %v1370_v33 = vunpack.c.l.b16 %v1041_v24  ;;  %v1035_v36 = vpack.c.bf16 %v974_v31, %v974_v31 }
 0x275   : > { %v1028_v34 = vsel %vm681_vm11, %v1027_v26, %v1010_v15  ;;  %v976_v38 = vsel %vm681_vm11, %v968_v6, %v975_v25  ;;  %v1030_v40 = vsel %vm681_vm11, %v1022_v21, %v1029_v46  ;;  %v762_v54 = vsel %vm681_vm11, %v2726_v47, %v761_v50 }
 0x276   : > { %v1347_v41 = vunpack.c.l.b16 %v1040_v30  ;;  %v1036_v43 = vpack.c.bf16 %v1028_v34, %v1028_v34  ;;  %v1371_v49 = vunpack.c.l.b16 %v1042_v32  ;;  %v1037_v51 = vpack.c.bf16 %v976_v38, %v976_v38  ;;  %v2799_v34 = vpop.permute.xlu2 %2126 }
 0x277   : > { %v1297_v52 = vunpack.c.l.b16 %v1035_v36  ;;  %v1038_v53 = vpack.c.bf16 %v1030_v40, %v1030_v40  ;;  %v773_v56 = vrot.slane %v2729_v48, 4  ;;  %v770_v63 = vperm.slane %v762_v54, %v2632_v39 }
 0x278   : > { %v1348_v57 = vpack.c.b16 %v1347_v41, %v1346_v20  ;;  %v1298_v58 = vunpack.c.l.b16 %v1036_v43  ;;  %v1372_v60 = vpack.c.b16 %v1371_v49, %v1370_v33  ;;  %v1322_v61 = vunpack.c.l.b16 %v1037_v51 }
 0x279   : > { %v1323_v62 = vunpack.c.l.b16 %v1038_v53  ;;  %v774_v0 = vsel %vm681_vm11, %v758_v28, %v773_v56  ;;  %v759_v3 = vrot.slane %v2726_v47, 4  ;;  %v771_v5 = vrot.slane %v758_v28, 4 }
 0x27a   : > { %v1353_v59 = vsel %vm1300_vm12, %v1348_v57, 0  ;;  %v1299_v1 = vpack.c.b16 %v1298_v58, %v1297_v52  ;;  %v1377_v42 = vsel %vm1300_vm12, %v1372_v60, 0  ;;  %v782_v50 = vperm.slane %v774_v0, %v2632_v39 }
 0x27b   : > { %1362 = vmatpush.bf16.xpose.msrb.mxu0 %v1353_v59  ;;  %1386 = vmatpush.bf16.xpose.msrb.mxu1 %v1377_v42  ;;  %v1324_v55 = vpack.c.b16 %v1323_v62, %v1322_v61  ;;  %v760_v4 = vsel %vm681_vm11, %v759_v3, %v2719_v35  ;;  %v789_v7 = vrot.slane %v770_v63, 4  ;;  %v772_v11 = vsel %vm681_vm11, %v771_v5, %v2729_v48 }
 0x27c   : > { %v1305_v2 = vsel %vm1300_vm12, %v1299_v1, 0  ;;  %v787_v8 = vrot.slane %v782_v50, 4  ;;  %v766_v47 = vperm.slane %v760_v4, %v2632_v39  ;;  %v778_v35 = vperm.slane %v772_v11, %v2632_v39 }
 0x27d   : > { %1314 = vmatpush.bf16.xpose.msra.mxu2 %v1305_v2  ;;  %v1329_v10 = vsel %vm1300_vm12, %v1324_v55, 0  ;;  %v790_v9 = vsel %vm681_vm11, %v782_v50, %v789_v7  ;;  %v2128_v0 = vunpack.i.l.bf16 %v2799_v34 }
 0x27e   : > { %1338 = vmatpush.bf16.xpose.msra.mxu3 %v1329_v10  ;;  %v788_v13 = vsel %vm681_vm11, %v787_v8, %v770_v63  ;;  %v785_v14 = vrot.slane %v766_v47, 4  ;;  %v783_v15 = vrot.slane %v778_v35, 4  ;;  %v794_v16 = vpack.c.bf16 %v790_v9, %v790_v9 }
 0x27f   : > { %v793_v6 = vpack.c.bf16 %v788_v13, %v788_v13  ;;  %v2129_v63 = vunpack.i.h.bf16 %v2799_v34 }
 0x280   : > { %v786_v17 = vsel %vm681_vm11, %v778_v35, %v785_v14  ;;  %v784_v18 = vsel %vm681_vm11, %v783_v15, %v766_v47  ;;  %v1069_v47 = vrot.slane %v2128_v0, 4 }
 0x281   : > { %v791_v48 = vpack.c.bf16 %v784_v18, %v784_v18  ;;  %v792_v20 = vpack.c.bf16 %v786_v17, %v786_v17  ;;  %v1125_v8 = vrot.slane %v2129_v63, 4 }
 0x282   : > { %1948 = vmatmul.msk.bf16.vlgmr.msrb.gmra.mxu0 %vm1300_vm12, %v793_v6  ;;  %1949 = vmatmul.msk.bf16.vlgmr.msrb.gmra.mxu1 %vm1300_vm12, %v794_v16 }
 0x284   : > { %1946 = vmatmul.msk.bf16.vlgmr.msra.gmra.mxu2 %vm1300_vm12, %v791_v48 }
 0x285   : > { %1947 = vmatmul.msk.bf16.vlgmr.msra.gmra.mxu3 %vm1300_vm12, %v792_v20 }
 0x2ff   : > { %v1364_v21 = vpop.f32.mrf.mxu0  ;;  %v1388_v45 = vpop.f32.mrf.mxu1 }
 0x300   : > { %v1399_v23 = vsel %vm1392_vm13, %v1364_v21, -inf  ;;  %v1402_v24 = vsel %vm1392_vm13, %v1388_v45, -inf }
 0x301   : > { %1400 = vmax.xlane.f32.xlu1 %v1399_v23  ;;  %1403 = vmax.xlane.f32.xlu0 %v1402_v24 }
 0x307   : > { %v1366_v25 = vpop.f32.mrf.mxu0  ;;  %v1390_v46 = vpop.f32.mrf.mxu1 }
 0x308   : > { %v1316_v19 = vpop.f32.mrf.mxu2  ;;  %v1340_v26 = vpop.f32.mrf.mxu3 }
 0x309   : > { %v1396_v27 = vsel %vm1392_vm13, %v1340_v26, -inf  ;;  %v1393_v28 = vsel %vm1392_vm13, %v1316_v19, -inf }
 0x30a   : > { %1397 = vmax.xlane.f32.xlu2 %v1396_v27  ;;  %1394 = vmax.xlane.f32.xlu0 %v1393_v28 }
 0x310   : > { %v1318_v30 = vpop.f32.mrf.mxu2  ;;  %v1342_v31 = vpop.f32.mrf.mxu3 }
 0x31a   : > { %2131 = vrot.lane.b32.xlu1 %v2636_v44, %s2385_s14 }
 0x31e   : > { %2136 = vrot.lane.b32.xlu0 %v2630_v37, %s2385_s14 }
 0x322   : > { %2141 = vrot.lane.b32.xlu2 %v2619_v22, %s2385_s14 }
 0x374   : > { %v1401_v32 = vpop.xlane.xlu1 %1400  ;;  %v1404_v33 = vpop.xlane.xlu0 %1403 }
 0x375   : > { %v1407_v36 = vsub.f32 %v1364_v21, %v1401_v32  ;;  %v1408_v53 = vsub.f32 %v1388_v45, %v1404_v33 }
 0x377   : > { %v1413_v38 = vmul.f32 1.442695, %v1407_v36  ;;  %v1415_v22 = vmul.f32 1.442695, %v1408_v53 }
 0x379   : > { %2161 = vpow2.f32 %v1413_v38 }
 0x37d   : > { %v1398_v40 = vpop.xlane.xlu2 %1397  ;;  %v1395_v41 = vpop.xlane.xlu0 %1394 }
 0x37e   : > { %v1406_v43 = vsub.f32 %v1340_v26, %v1398_v40  ;;  %v1405_v49 = vsub.f32 %v1316_v19, %v1395_v41 }
 0x37f   : > { %v2801_v51 = vpop.eup %2161 }
 0x380   : > { %v1411_v44 = vmul.f32 1.442695, %v1406_v43  ;;  %v1409_v52 = vmul.f32 1.442695, %v1405_v49  ;;  %v1423_v37 = vsel %vm1392_vm13, %v2801_v51, 0.0 }
 0x381   : > { %1424 = vadd.xlane.f32.xlu2 %v1423_v37 }
 0x382   : > { %2163 = vpow2.f32 %v1411_v44 }
 0x383   : > { %2165 = vpow2.f32 %v1409_v52 }
 0x384   : > { %2167 = vpow2.f32 %v1415_v22 }
 0x385   : > { %v2142_v54 = vpop.permute.xlu2 %2141 }
 0x386   : > { %v2144_v58 = vunpack.i.h.bf16 %v2142_v54  ;;  %v2143_v60 = vunpack.i.l.bf16 %v2142_v54 }
 0x388   : > { %v2805_v56 = vpop.eup %2163  ;;  %v1135_v59 = vrot.slane %v2144_v58, 4  ;;  %v1079_v1 = vrot.slane %v2143_v60, 4 }
 0x389   : > { %v2807_v57 = vpop.eup %2165  ;;  %v1420_v61 = vsel %vm1392_vm13, %v2805_v56, 0.0 }
 0x38a   : > { %1421 = vadd.xlane.f32.xlu1 %v1420_v61  ;;  %v1417_v62 = vsel %vm1392_vm13, %v2807_v57, 0.0  ;;  %v2815_v55 = vpop.eup %2167 }
 0x38b   : > { %1418 = vadd.xlane.f32.xlu0 %v1417_v62  ;;  %v1426_v17 = vsel %vm1392_vm13, %v2815_v55, 0.0 }
 0x38c   : > { %v2132_v3 = vpop.permute.xlu1 %2131 }
 0x38d   : > { %v2134_v42 = vunpack.i.h.bf16 %v2132_v3  ;;  %v2133_v50 = vunpack.i.l.bf16 %v2132_v3 }
 0x38f   : > { %v1137_v4 = vrot.slane %v2134_v42, 4  ;;  %v1080_v5 = vsel %vm681_vm11, %v1079_v1, %v2133_v50  ;;  %v1081_v7 = vrot.slane %v2133_v50, 4  ;;  %v1136_v2 = vsel %vm681_vm11, %v1135_v59, %v2134_v42 }
 0x390   : > { %v1086_v10 = vperm.slane %v1080_v5, %v2623_v29  ;;  %v1142_v11 = vperm.slane %v1136_v2, %v2623_v29  ;;  %v2137_v9 = vpop.permute.xlu0 %2136 }
 0x391   : > { %v1082_v13 = vsel %vm681_vm11, %v2143_v60, %v1081_v7  ;;  %v1138_v35 = vsel %vm681_vm11, %v2144_v58, %v1137_v4  ;;  %v2139_v14 = vunpack.i.h.bf16 %v2137_v9  ;;  %v2138_v6 = vunpack.i.l.bf16 %v2137_v9 }
 0x392   : > { %v1090_v15 = vperm.slane %v1082_v13, %v2623_v29  ;;  %v1146_v16 = vperm.slane %v1138_v35, %v2623_v29  ;;  %v1091_v46 = vrot.slane %v1086_v10, 4  ;;  %v1147_v19 = vrot.slane %v1142_v11, 4 }
 0x393   : > { %v1123_v18 = vrot.slane %v2139_v14, 4  ;;  %v1126_v48 = vsel %vm681_vm11, %v2139_v14, %v1125_v8  ;;  %v1067_v20 = vrot.slane %v2138_v6, 4  ;;  %v1070_v21 = vsel %vm681_vm11, %v2138_v6, %v1069_v47  ;;  %1427 = vadd.xlane.f32.xlu0 %v1426_v17 }
 0x394   : > { %v1103_v45 = vrot.slane %v1090_v15, 4  ;;  %v1159_v23 = vrot.slane %v1146_v16, 4  ;;  %v1134_v24 = vperm.slane %v1126_v48, %v2623_v29  ;;  %v1078_v25 = vperm.slane %v1070_v21, %v2623_v29 }
 0x395   : > { %v1124_v26 = vsel %vm681_vm11, %v1123_v18, %v2129_v63  ;;  %v1068_v27 = vsel %vm681_vm11, %v1067_v20, %v2128_v0 }
 0x396   : > { %v1130_v28 = vperm.slane %v1124_v26, %v2623_v29  ;;  %v1161_v30 = vrot.slane %v1134_v24, 4  ;;  %v1074_v31 = vperm.slane %v1068_v27, %v2623_v29  ;;  %v1104_v32 = vsel %vm681_vm11, %v1103_v45, %v1078_v25 }
 0x397   : > { %v1105_v33 = vrot.slane %v1078_v25, 4  ;;  %v1110_v34 = vperm.slane %v1104_v32, %v2632_v39  ;;  %v1160_v36 = vsel %vm681_vm11, %v1159_v23, %v1134_v24 }
 0x398   : > { %v1149_v38 = vrot.slane %v1130_v28, 4  ;;  %v1092_v40 = vsel %vm681_vm11, %v1091_v46, %v1074_v31  ;;  %v1093_v41 = vrot.slane %v1074_v31, 4  ;;  %v1148_v43 = vsel %vm681_vm11, %v1147_v19, %v1130_v28 }
 0x399   : > { %v1098_v49 = vperm.slane %v1092_v40, %v2632_v39  ;;  %v1106_v44 = vsel %vm681_vm11, %v1090_v15, %v1105_v33  ;;  %v1119_v52 = vrot.slane %v1110_v34, 4  ;;  %v1154_v37 = vperm.slane %v1148_v43, %v2632_v39 }
 0x39a   : > { %v1094_v53 = vsel %vm681_vm11, %v1086_v10, %v1093_v41  ;;  %v1114_v22 = vperm.slane %v1106_v44, %v2632_v39  ;;  %v1150_v54 = vsel %vm681_vm11, %v1142_v11, %v1149_v38  ;;  %v1162_v58 = vsel %vm681_vm11, %v1146_v16, %v1161_v30 }
 0x39b   : > { %v1102_v60 = vperm.slane %v1094_v53, %v2632_v39  ;;  %v1115_v61 = vrot.slane %v1098_v49, 4  ;;  %v1158_v62 = vperm.slane %v1150_v54, %v2632_v39  ;;  %v1166_v0 = vperm.slane %v1160_v36, %v2632_v39 }
 0x39c   : > { %v1121_v63 = vrot.slane %v1114_v22, 4  ;;  %v1170_v3 = vperm.slane %v1162_v58, %v2632_v39  ;;  %v1171_v59 = vrot.slane %v1154_v37, 4  ;;  %v1120_v50 = vsel %vm681_vm11, 0.0, %v1119_v52 }
 0x39d   : > { %v1116_v1 = vsel %vm681_vm11, 0.0, %v1115_v61  ;;  %v1117_v42 = vrot.slane %v1102_v60, 4  ;;  %v1173_v4 = vrot.slane %v1158_v62, 4  ;;  %v1175_v2 = vrot.slane %v1166_v0, 4 }
 0x39e   : > { %v1122_v5 = vsel %vm681_vm11, 0.0, %v1121_v63  ;;  %v1172_v7 = vsel %vm681_vm11, 0.0, %v1171_v59  ;;  %v1177_v8 = vrot.slane %v1170_v3, 4  ;;  %v1190_v9 = vsel %vm681_vm11, %v1121_v63, %v1110_v34 }
 0x39f   : > { %v1118_v47 = vsel %vm681_vm11, 0.0, %v1117_v42  ;;  %v1174_v10 = vsel %vm681_vm11, 0.0, %v1173_v4  ;;  %v1179_v11 = vsel %vm681_vm11, %v1117_v42, %v1098_v49  ;;  %v1176_v13 = vsel %vm681_vm11, 0.0, %v1175_v2 }
 0x3a0   : > { %v1178_v35 = vsel %vm681_vm11, 0.0, %v1177_v8  ;;  %v1183_v14 = vperm.slane %v1179_v11, %v2623_v29  ;;  %v1184_v6 = vrot.slane %v1118_v47, 4  ;;  %v1194_v15 = vperm.slane %v1190_v9, %v2623_v29 }
 0x3a1   : > { %v1195_v16 = vrot.slane %v1122_v5, 4  ;;  %v1233_v17 = vsel %vm681_vm11, %v1173_v4, %v1154_v37  ;;  %v1238_v18 = vrot.slane %v1174_v10, 4  ;;  %v1244_v21 = vsel %vm681_vm11, %v1177_v8, %v1166_v0 }
 0x3a2   : > { %v1185_v48 = vsel %vm681_vm11, %v1184_v6, %v1116_v1  ;;  %v1237_v20 = vperm.slane %v1233_v17, %v2623_v29  ;;  %v1249_v45 = vrot.slane %v1178_v35, 4  ;;  %v1215_v24 = vrot.slane %v1194_v15, 4 }
 0x3a3   : > { %v1196_v23 = vsel %vm681_vm11, %v1195_v16, %v1120_v50  ;;  %v1239_v25 = vsel %vm681_vm11, %v1238_v18, %v1172_v7  ;;  %v1248_v46 = vperm.slane %v1244_v21, %v2623_v29  ;;  %v1189_v27 = vperm.slane %v1185_v48, %v2623_v29 }
 0x3a4   : > { %v1200_v19 = vperm.slane %v1196_v23, %v2623_v29  ;;  %v1250_v26 = vsel %vm681_vm11, %v1249_v45, %v1176_v13  ;;  %v1203_v28 = vrot.slane %v1183_v14, 4  ;;  %v1243_v32 = vperm.slane %v1239_v25, %v2623_v29 }
 0x3a5   : > { %v1254_v30 = vperm.slane %v1250_v26, %v2623_v29  ;;  %v1269_v31 = vrot.slane %v1248_v46, 4  ;;  %v1257_v33 = vrot.slane %v1237_v20, 4  ;;  %v1201_v38 = vrot.slane %v1189_v27, 4 }
 0x3a6   : > { %v1204_v34 = vsel %vm681_vm11, %v1189_v27, %v1203_v28  ;;  %v1216_v36 = vsel %vm681_vm11, %v1200_v19, %v1215_v24  ;;  %v1213_v40 = vrot.slane %v1200_v19, 4  ;;  %v1255_v61 = vrot.slane %v1243_v32, 4 }
 0x3a7   : > { %v1212_v41 = vperm.slane %v1204_v34, %v2632_v39  ;;  %v1224_v43 = vperm.slane %v1216_v36, %v2632_v39  ;;  %v1258_v49 = vsel %vm681_vm11, %v1243_v32, %v1257_v33  ;;  %v1270_v44 = vsel %vm681_vm11, %v1254_v30, %v1269_v31 }
 0x3a8   : > { %v1266_v52 = vperm.slane %v1258_v49, %v2632_v39  ;;  %v1278_v37 = vperm.slane %v1270_v44, %v2632_v39  ;;  %v1202_v53 = vsel %vm681_vm11, %v1201_v38, %v1183_v14  ;;  %v1214_v22 = vsel %vm681_vm11, %v1213_v40, %v1194_v15 }
 0x3a9   : > { %v1229_v54 = vrot.slane %v1224_v43, 4  ;;  %v1208_v58 = vperm.slane %v1202_v53, %v2632_v39  ;;  %v1220_v60 = vperm.slane %v1214_v22, %v2632_v39  ;;  %v1267_v63 = vrot.slane %v1254_v30, 4 }
 0x3aa   : > { %v1283_v62 = vrot.slane %v1278_v37, 4  ;;  %v1231_v0 = vrot.slane %v1212_v41, 4  ;;  %v1285_v3 = vrot.slane %v1266_v52, 4  ;;  %v1256_v42 = vsel %vm681_vm11, %v1255_v61, %v1237_v20 }
 0x3ab   : > { %v1230_v59 = vsel %vm681_vm11, %v1229_v54, %v1212_v41  ;;  %v1225_v1 = vrot.slane %v1220_v60, 4  ;;  %v1227_v50 = vrot.slane %v1208_v58, 4  ;;  %v1262_v7 = vperm.slane %v1256_v42, %v2632_v39 }
 0x3ac   : > { %v1284_v4 = vsel %vm681_vm11, %v1283_v62, %v1266_v52  ;;  %v1291_v5 = vpack.c.bf16 %v1230_v59, %v1230_v59  ;;  %v1268_v2 = vsel %vm681_vm11, %v1267_v63, %v1248_v46  ;;  %v1232_v11 = vsel %vm681_vm11, %v1224_v43, %v1231_v0 }
 0x3ad   : > { %v1292_v8 = vpack.c.bf16 %v1284_v4, %v1284_v4  ;;  %v1226_v47 = vsel %vm681_vm11, %v1225_v1, %v1208_v58  ;;  %v1274_v10 = vperm.slane %v1268_v2, %v2632_v39  ;;  %v1286_v35 = vsel %vm681_vm11, %v1278_v37, %v1285_v3 }
 0x3ae   : > { %v1487_v9 = vunpack.c.l.b16 %v1291_v5  ;;  %v1287_v13 = vpack.c.bf16 %v1226_v47, %v1226_v47  ;;  %v1293_v14 = vpack.c.bf16 %v1232_v11, %v1232_v11  ;;  %v1294_v16 = vpack.c.bf16 %v1286_v35, %v1286_v35 }
 0x3af   : > { %v1488_v6 = vunpack.c.l.b16 %v1292_v8  ;;  %v1279_v15 = vrot.slane %v1274_v10, 4  ;;  %v1228_v17 = vsel %vm681_vm11, %v1220_v60, %v1227_v50  ;;  %v1281_v48 = vrot.slane %v1262_v7, 4 }
 0x3b0   : > { %v1509_v18 = vunpack.c.l.b16 %v1293_v14  ;;  %v1289_v20 = vpack.c.bf16 %v1228_v17, %v1228_v17  ;;  %v1510_v23 = vunpack.c.l.b16 %v1294_v16  ;;  %v1443_v25 = vunpack.c.l.b16 %v1287_v13 }
 0x3b1   : > { %v1489_v21 = vpack.c.b16 %v1488_v6, %v1487_v9  ;;  %v1280_v45 = vsel %vm681_vm11, %v1279_v15, %v1262_v7  ;;  %v1282_v46 = vsel %vm681_vm11, %v1274_v10, %v1281_v48 }
 0x3b2   : > { %v1288_v24 = vpack.c.bf16 %v1280_v45, %v1280_v45  ;;  %v1511_v19 = vpack.c.b16 %v1510_v23, %v1509_v18  ;;  %v1290_v26 = vpack.c.bf16 %v1282_v46, %v1282_v46  ;;  %v1465_v27 = vunpack.c.l.b16 %v1289_v20 }
 0x3b3   : > { %1501 = vmatpush.bf16.msra.mxu0 %v1489_v21 }
 0x3b4   : > { %v1444_v28 = vunpack.c.l.b16 %v1288_v24  ;;  %1523 = vmatpush.bf16.msra.mxu1 %v1511_v19  ;;  %v1466_v30 = vunpack.c.l.b16 %v1290_v26 }
 0x3b6   : > { %v1445_v31 = vpack.c.b16 %v1444_v28, %v1443_v25  ;;  %v1467_v32 = vpack.c.b16 %v1466_v30, %v1465_v27 }
 0x3b8   : > { %1457 = vmatpush.bf16.msrb.mxu2 %v1445_v31  ;;  %1479 = vmatpush.bf16.msrb.mxu3 %v1467_v32 }
 0x3f4   : > { %v1425_v33 = vpop.xlane.xlu2 %1424 }
 0x3f5   : > { %2169 = vrcp.f32 %v1425_v33 }
 0x3fb   : > { %v2170_v34 = vpop.eup %2169 }
 0x3fc   : > { %v1435_v36 = vmul.f32 %v2170_v34, %v2801_v51 }
 0x3fd   : > { %v1422_v38 = vpop.xlane.xlu1 %1421 }
 0x3fe   : > { %v1439_v40 = vpack.c.bf16 %v1435_v36, %v1435_v36  ;;  %2171 = vrcp.f32 %v1422_v38  ;;  %v1419_v41 = vpop.xlane.xlu0 %1418 }
 0x3ff   : > { %2173 = vrcp.f32 %v1419_v41 }
 0x400   : > { %1952 = vmatmul.msk.bf16.vlgmr.msra.gmra.mxu0 %vm1392_vm13, %v1439_v40 }
 0x404   : > { %v2172_v43 = vpop.eup %2171 }
 0x405   : > { %v2174_v49 = vpop.eup %2173  ;;  %v1434_v44 = vmul.f32 %v2172_v43, %v2805_v56 }
 0x406   : > { %v1433_v52 = vmul.f32 %v2174_v49, %v2807_v57  ;;  %v1428_v37 = vpop.xlane.xlu0 %1427 }
 0x407   : > { %2175 = vrcp.f32 %v1428_v37  ;;  %v1438_v53 = vpack.c.bf16 %v1434_v44, %v1434_v44 }
 0x408   : > { %v1437_v22 = vpack.c.bf16 %v1433_v52, %v1433_v52 }
 0x409   : > { %1951 = vmatmul.msk.bf16.vlgmr.msrb.gmra.mxu3 %vm1392_vm13, %v1438_v53 }
 0x40a   : > { %1950 = vmatmul.msk.bf16.vlgmr.msrb.gmra.mxu2 %vm1392_vm13, %v1437_v22 }
 0x40d   : > { %v2176_v51 = vpop.eup %2175 }
 0x40e   : > { %v1436_v54 = vmul.f32 %v2176_v51, %v2815_v55 }
 0x410   : > { %v1440_v58 = vpack.c.bf16 %v1436_v54, %v1436_v54 }
 0x412   : > { %1953 = vmatmul.msk.bf16.vlgmr.msra.gmra.mxu1 %vm1392_vm13, %v1440_v58 }
 0x47d   : > { %v1503_v60 = vpop.f32.mrf.mxu0 }
 0x47e   : > { %v1529_v62 = vrot.slane %v1503_v60, 4 }
 0x485   : > { %v1505_v61 = vpop.f32.mrf.mxu0 }
 0x48c   : > { %v1481_v56 = vpop.f32.mrf.mxu3 }
 0x48d   : > { %v1459_v63 = vpop.f32.mrf.mxu2  ;;  %v1543_v57 = vrot.slane %v1481_v56, 4 }
 0x48e   : > { %v1530_v0 = vsel %vm681_vm11, %v1529_v62, %v1459_v63  ;;  %v1531_v3 = vrot.slane %v1459_v63, 4 }
 0x48f   : > { %v1536_v59 = vperm.slane %v1530_v0, %v2623_v29  ;;  %v1525_v1 = vpop.f32.mrf.mxu1 }
 0x490   : > { %v1532_v42 = vsel %vm681_vm11, %v1503_v60, %v1531_v3  ;;  %v1541_v50 = vrot.slane %v1525_v1, 4  ;;  %v1544_v55 = vsel %vm681_vm11, %v1525_v1, %v1543_v57 }
 0x491   : > { %v1540_v4 = vperm.slane %v1532_v42, %v2623_v29  ;;  %v1552_v5 = vperm.slane %v1544_v55, %v2623_v29  ;;  %v1555_v2 = vrot.slane %v1536_v59, 4 }
 0x492   : > { %v1542_v7 = vsel %vm681_vm11, %v1541_v50, %v1481_v56 }
 0x493   : > { %v1567_v8 = vrot.slane %v1540_v4, 4  ;;  %v1548_v47 = vperm.slane %v1542_v7, %v2623_v29  ;;  %v1565_v10 = vrot.slane %v1552_v5, 4 }
 0x494   : > { %v1483_v11 = vpop.f32.mrf.mxu3 }
 0x495   : > { %v1553_v9 = vrot.slane %v1548_v47, 4  ;;  %v1556_v13 = vsel %vm681_vm11, %v1548_v47, %v1555_v2  ;;  %v1566_v35 = vsel %vm681_vm11, %v1565_v10, %v1540_v4  ;;  %v1568_v14 = vsel %vm681_vm11, %v1552_v5, %v1567_v8  ;;  %v1461_v6 = vpop.f32.mrf.mxu2  ;;  %v2181_v4 = vld [vmem:[%s2579_s19] sm:$0xff] }
 0x496   : > { %v1564_v15 = vperm.slane %v1556_v13, %v2632_v39  ;;  %v1572_v16 = vperm.slane %v1566_v35, %v2632_v39  ;;  %v1576_v17 = vperm.slane %v1568_v14, %v2632_v39  ;;  %v1990_v13 = vld [vmem:[#allocation7] sm:$0xff] }
 0x497   : > { %v1554_v18 = vsel %vm681_vm11, %v1553_v9, %v1536_v59  ;;  %v1527_v48 = vpop.f32.mrf.mxu1  ;;  %v1991_v9 = vld [vmem:[#allocation7 + $0x8] sm:$0xff] }
 0x498   : > { %v1560_v20 = vperm.slane %v1554_v18, %v2632_v39  ;;  %v1579_v21 = vrot.slane %v1564_v15, 4  ;;  %v1581_v45 = vrot.slane %v1572_v16, 4  ;;  %v1583_v23 = vrot.slane %v1576_v17, 4  ;;  %1718 = vmatpush.bf16.msra.mxu2 %v1991_v9 }
 0x49a   : > { %v1577_v24 = vrot.slane %v1560_v20, 4  ;;  %v1580_v25 = vsel %vm681_vm11, 0.0, %v1579_v21  ;;  %v1584_v46 = vsel %vm681_vm11, 0.0, %v1583_v23  ;;  %v1596_v26 = vsel %vm681_vm11, %v1583_v23, %v1572_v16 }
 0x49b   : > { %v1590_v19 = vrot.slane %v1580_v25, 4  ;;  %v1601_v27 = vrot.slane %v1584_v46, 4  ;;  %v1585_v28 = vsel %vm681_vm11, %v1579_v21, %v1560_v20  ;;  %v1582_v30 = vsel %vm681_vm11, 0.0, %v1581_v45  ;;  %v2149_v21 = vld [vmem:[%s3036_s7] ss:$0 sm:$0xff] }
 0x49c   : > { %v1578_v31 = vsel %vm681_vm11, 0.0, %v1577_v24  ;;  %v1589_v32 = vperm.slane %v1585_v28, %v2623_v29  ;;  %v1600_v33 = vperm.slane %v1596_v26, %v2623_v29  ;;  %1719 = vmatpush.bf16.msra.mxu2 %v1990_v13  ;;  %v1994_v26 = vld [vmem:[%s3040_s11 + $0x10] sm:$0xff] }
 0x49d   : > { %v1591_v34 = vsel %vm681_vm11, %v1590_v19, %v1578_v31  ;;  %v1602_v36 = vsel %vm681_vm11, %v1601_v27, %v1582_v30  ;;  %v1995_v19 = vld [vmem:[%s3040_s11 + $0x18] sm:$0xff]  ;;  %v2151_v27 = vld [vmem:[%s3039_s10] ss:$0 sm:$0xff]  ;;  %v1993_v30 = vld [vmem:[%s3040_s11 + $0x8] sm:$0xff] }
 0x49e   : > { %v1595_v38 = vperm.slane %v1591_v34, %v2623_v29  ;;  %v1606_v40 = vperm.slane %v1602_v36, %v2623_v29  ;;  %v1609_v41 = vrot.slane %v1589_v32, 4  ;;  %v1621_v43 = vrot.slane %v1600_v33, 4  ;;  %1779 = vmatpush.bf16.msra.mxu3 %v1995_v19 }
 0x4a0   : > { %v1610_v49 = vsel %vm681_vm11, %v1595_v38, %v1609_v41  ;;  %v1622_v44 = vsel %vm681_vm11, %v1606_v40, %v1621_v43  ;;  %v1607_v52 = vrot.slane %v1595_v38, 4  ;;  %v1619_v37 = vrot.slane %v1606_v40, 4 }
 0x4a1   : > { %v1618_v53 = vperm.slane %v1610_v49, %v2632_v39  ;;  %v1630_v22 = vperm.slane %v1622_v44, %v2632_v39 }
 0x4a2   : > { %v1608_v51 = vsel %vm681_vm11, %v1607_v52, %v1589_v32  ;;  %v1620_v54 = vsel %vm681_vm11, %v1619_v37, %v1600_v33  ;;  %1780 = vmatpush.bf16.msra.mxu3 %v1994_v26  ;;  %v1992_v33 = vld [vmem:[%s3040_s11] sm:$0xff] }
 0x4a3   : > { %v1637_v58 = vrot.slane %v1618_v53, 4  ;;  %v1635_v60 = vrot.slane %v1630_v22, 4  ;;  %v1614_v29 = vperm.slane %v1608_v51, %v2632_v39  ;;  %v1626_v61 = vperm.slane %v1620_v54, %v2632_v39 }
 0x4a5   : > { %v1638_v62 = vsel %vm681_vm11, %v1630_v22, %v1637_v58  ;;  %v1636_v56 = vsel %vm681_vm11, %v1635_v60, %v1618_v53  ;;  %v1631_v63 = vrot.slane %v1626_v61, 4  ;;  %v1633_v57 = vrot.slane %v1614_v29, 4  ;;  %v2152_v53 = vld [vmem:[%s3074_s16] ss:$0 sm:$0xff] }
 0x4a6   : > { %1648 = vrot.lane.b32.xlu0 %v1638_v62, %s2388_s15  ;;  %1644 = vrot.lane.b32.xlu2 %v1636_v56, %s2389_s18  ;;  %s1981_s15 = sshll.u32 %s2362_s29, 1  ;;  %s493_s18 = sand.u32 1, %s2350_s26  }
 0x4a7   : > { %v1634_v0 = vsel %vm681_vm11, %v1626_v61, %v1633_v57  ;;  %v1632_v3 = vsel %vm681_vm11, %v1631_v63, %v1614_v29  ;;  %1781 = vmatpush.bf16.msra.mxu3 %v1993_v30  ;;  %s1924_s19 = sshll.u32 %s493_s18, 3 }
 0x4a8   : > { %1640 = vrot.lane.b32.xlu1 %v1634_v0, %s2390_s30  ;;  %s1801_s30 = sadd.s32 %s2358_s28, %s1981_s15  ;;  %s495_s5 = scalar_lea.vmem [#allocation8], %s1924_s19 }
 0x4a9   : > { %s1982_s22 = sshll.u32 %s1801_s30, 3  ;;  %s1805_s12 = sshll.u32 %s495_s5, 4  ;;  %s1806_s12 = int_to_ptr.vmem [resolvable:$true] %s1805_s12 }
 0x4aa   : > { %s1803_s13 = scalar_lea.hbm %s3075_s17, %s1982_s22  ;;  %s1791_s28 = scalar_lea.sflag [#allocation4], %s493_s18 }
 0x4ab   : > { %1782 = vmatpush.bf16.msra.mxu3 %v1992_v33  ;;  %s1807_s27 = sshll.u32 %s1803_s13, 4  ;;  %s2292_s19 = scalar_lea.hbm %s3075_s17, 32  ;;  %s1808_s27 = int_to_ptr.hbm [resolvable:$true] %s1807_s27 }
 0x4ac   : > { %s2286_s29 = sshra.s32 %s1808_s27, 4  ;;  %s2287_s29 = int_to_ptr.hbm [resolvable:$true] %s2286_s29 }
 0x4ad   : > { %s2288_s14 = scalar_lea.hbm %s2287_s29, 8  ;;  %p2293_p6 = scmp.lt.s32.totalorder %s2287_s29, %s3075_s17 }
 0x4ae   : > { %p2289_p2 = scmp.ne.s32.totalorder %s2287_s29, %s2288_s14  ;;  %p2294_p7 = scmp.lt.s32.totalorder %s2292_s19, %s2288_s14 }
 0x4b0   : > { %p2290_p4 = pnand %p2289_p2, %p2513_p3  ;;  %p2295_p9 = por %p2294_p7, %p2293_p6 }
 0x4b2   : > { %p2291_p5 = pneg %p2290_p4 }
 0x4b4   : > { %p2296_p10 = pnand %p2295_p9, %p2291_p5 }
 0x500   : > { %v1645_v39 = vpop.permute.xlu2 %1644 }
 0x518   : > { %v1649_v42 = vpop.permute.xlu0 %1648 }
 0x51a   : > { %v1641_v59 = vpop.permute.xlu1 %1640 }
 0x51b   : > { %v1651_v1 = vsel %vm1300_vm12, %v1632_v3, %v1641_v59 }
 0x51c   : > { %v1652_v50 = vsel %vm1392_vm13, %v1651_v1, %v1645_v39 }
 0x51d   : > { %v1654_v55 = vsel %vm1653_vm14, %v1652_v50, %v1649_v42 }
 0x51e   : > { %v2950_v5 = vadd.f32 %v2181_v4, %v1654_v55 }
 0x520   : > { %v1658_v7 = vsel %vm509_vm0, %v2950_v5, 0.0 }
 0x521   : > { %1659 = vadd.xlane.f32.xlu1 %v1658_v7 }
 0x594   : > { %v1660_v2 = vpop.xlane.xlu1 %1659 }
 0x595   : > { %v1661_v8 = vmul.f32 %v1660_v2, %v2585_v12 }
 0x597   : > { %v1662_v47 = vsub.f32 %v2950_v5, %v1661_v8 }
 0x599   : > { %v1663_v10 = vmul.f32 %v1662_v47, %v1662_v47 }
 0x59b   : > { %v1664_v11 = vsel %vm509_vm0, %v1663_v10, 0.0 }
 0x59c   : > { %1665 = vadd.xlane.f32.xlu0 %v1664_v11 }
 0x60f   : > { %v1666_v35 = vpop.xlane.xlu0 %1665 }
 0x610   : > { %v1667_v14 = vmul.f32 %v1666_v35, %v2585_v12  ;;  %v2150_v12 = vld [vmem:[%s3037_s8] ss:$0 sm:$0xff] }
 0x612   : > { %v1668_v6 = vadd.f32 1e-05, %v1667_v14 }
 0x614   : > { %2177 = vrsqrt.f32 %v1668_v6  ;;  %vm1675_vm1 = vweird.f32 %v1668_v6 }
 0x61a   : > { %v2178_v15 = vpop.eup %2177 }
 0x61b   : > { %v1670_v16 = vmul.f32 %v2178_v15, %v1668_v6  ;;  %vm1676_vm15 = vweird.f32 %v2178_v15 }
 0x61c   : > { %vm1677_vm2 = vmor %vm1675_vm1, %vm1676_vm15 }
 0x61d   : > { %v1671_v17 = vmul.f32 %v2178_v15, %v1670_v16 }
 0x61f   : > { %v1672_v18 = vmul.f32 0.5, %v1671_v17 }
 0x621   : > { %v1673_v48 = vsub.f32 1.5, %v1672_v18 }
 0x623   : > { %v1674_v20 = vmul.f32 %v2178_v15, %v1673_v48 }
 0x625   : > { %v1678_v45 = vsel %vm1677_vm2, %v2178_v15, %v1674_v20 }
 0x626   : > { %v1679_v23 = vmul.f32 %v1678_v45, %v1662_v47 }
 0x628   : > { %v1683_v24 = vmul.f32 %v2149_v21, %v1679_v23 }
 0x62a   : > { %v1687_v25 = vadd.f32 %v2150_v12, %v1683_v24 }
 0x62c   : > { %v1688_v46 = vpack.c.bf16 %v1687_v25, %v1687_v25 }
 0x62e   : > { %1962 = vmatmul.msk.bf16.vlgmr.msra.gmra.mxu2 %vm509_vm0, %v1688_v46 }
 0x6b1   : > { %v1721_v28 = vpop.f32.mrf.mxu2 }
 0x6b2   : > { %v1722_v31 = vadd.f32 %v2151_v27, %v1721_v28 }
 0x6b4   : > { %v1725_v32 = vmul.f32 %v1722_v31, %v1722_v31 }
 0x6b6   : > { %v1726_v34 = vmul.f32 %v1725_v32, %v1722_v31 }
 0x6b8   : > { %v1727_v36 = vmul.f32 0.044715, %v1726_v34 }
 0x6b9   : > { %v1723_v38 = vpop.f32.mrf.mxu2 }
 0x6ba   : > { %v1728_v40 = vadd.f32 %v1727_v36, %v1722_v31 }
 0x6bc   : > { %v1729_v41 = vmul.f32 0.7978846, %v1728_v40 }
 0x6be   : > { %2179 = vtanh.f32 %v1729_v41 }
 0x6c4   : > { %v2180_v43 = vpop.eup %2179 }
 0x6c5   : > { %v1731_v49 = vadd.f32 1.0, %v2180_v43 }
 0x6c7   : > { %v1732_v44 = vmul.f32 0.5, %v1731_v49 }
 0x6c9   : > { %v1733_v52 = vmul.f32 %v1732_v44, %v1722_v31 }
 0x6cb   : > { %v1734_v37 = vpack.c.bf16 %v1733_v52, %v1733_v52 }
 0x6cd   : > { %1979 = vmatmul.msk.bf16.vlgmr.msra.gmra.mxu3 %vm1771_vm3, %v1734_v37 }
 0x750   : > { %v1784_v22 = vpop.f32.mrf.mxu3 }
 0x751   : > { %v1785_v51 = vadd.f32 %v2152_v53, %v1784_v22 }
 0x753   : > { %v1788_v54 = vadd.f32 %v1785_v51, %v2950_v5 }
 0x755   : > { %1789 = vst.msk [vmem:[%s495_s5] sm:$0xff] %vm509_vm0, %v1788_v54 }
 0x756   : > { %2299 = shalt.err (!%p2296_p10)
}
 0x757   : > { %2008 = dma.vmem_to_hbm [thread:$0]  (%p2513_p3), %s1806_s12, 128, %s1808_s27, %s1791_s28  }
 0x758   : > { %v1786_v58 = vpop.f32.mrf.mxu3 }
 0x759 PF: > { %s3077_s18 = sld [smem:[#allocation16_spill]] }
 0x75a   : > { %s3078_s21 = sld [smem:[#allocation12_spill]] }
 0x75f   : > { %p2030_p11 = scmp.ge.s32.totalorder %s3077_s18, 2 }
 0x760   : > { %s1819_s24 = sand.u32 1, %s3078_s21  }
 0x761   : > { %p2021_p12 = pnand %p2030_p11, %p2522_p8  ;;  %s1820_s25 = scalar_lea.sflag [#allocation4], %s1819_s24 }
 0x763   : > { %p2022_p13 = pneg %p2021_p12 }
 0x765   : > { %2341 = dma.done.wait (%p2022_p13), %s1820_s25, 128  }
 0x766   : > { %2343 = vsyncadd (%p2022_p13), %s1820_s25, 4294967168  ;;  %s28_s15 = sadd.s32 1, %s3077_s18   ;;  %s3080_s13 = sld [smem:[#allocation13_spill]] }
 0x767   : > { %p25_p0 = scmp.ge.s32.totalorder %s28_s15, 6   ;;  %s3081_s27 = sld [smem:[#allocation21_spill]] }
 0x768   : > { %s3082_s28 = sld [smem:[#allocation14_spill]]  ;;  %s3086_s25 = smov %s2350_s26 }
 0x769   : > { %s3083_s29 = sld [smem:[#allocation15_spill]]  ;;  %27 = sbr.rel (!%p25_p0) target bundleno = 11 (0xb), region = 121 }
 0x76a   : > { %s3084_s30 = sld [smem:[#allocation17_spill]] }
 0x76b   : > { %s3085_s14 = sld [smem:[#allocation19_spill]] }
 0x76c   : > { %s3087_s26 = smov %s3080_s13 }
 0x76e   :  { %1826 = vsyncpa [#allocation3], 1 }
 0x76f   :  { %1828 = vsyncpa [#allocation3 + $0x1], 1 }
 0x770   :  { %1829 = vsyncpa [#allocation6], 1 }
 0x771   :  { %1830 = vsyncpa [#allocation4], 1 }
 0x772   :  { %1832 = vsyncpa [#allocation4 + $0x1], 1 }

</bundles_post_ra>
